<compile_context>
chip_gen: v7x
topology: tpu7x:2x2x1
jax: 0.10.0
libtpu: 0.0.40
codegen_flags: <defaults>
</compile_context>

<pallas_src>
import jax
import jax.numpy as jnp
from jax import lax
from jax.experimental import pallas as pl
from jax.experimental.pallas import tpu as pltpu

LANE = 128


def _round_up(x, m):
    return (x + m - 1) // m * m


# ------------------------- parameter preparation ---------------------------- #
def prepare_mem_relu_params(w_oihw, bias, bn_gamma, bn_beta, bn_mean, bn_var,
                            decay, eps=1e-5):
    """fuse_conv_bn_eval + layout packing. Done once, outside the timestep loop."""
    Cout, Cin, KH, KW = w_oihw.shape
    assert (KH, KW) == (3, 3), "kernel specialised for 3x3, stride 1, pad 1"
    Cp = _round_up(Cout, LANE)

    scale = bn_gamma / jnp.sqrt(bn_var + eps)
    w_fused = w_oihw * scale[:, None, None, None]                  # OIHW
    b_fused = bn_beta + (bias - bn_mean) * scale                   # (Cout,)

    # OIHW -> (kh, kw, cin, cout) -> (3, 3*Cin, Cout): per-kh weight slab whose
    # row index is kw*Cin + c, matching the in-kernel slab concat order.
    w_taps = jnp.transpose(w_fused, (2, 3, 1, 0)).reshape(KH, KW * Cin, Cout)
    w_taps = jnp.pad(w_taps, ((0, 0), (0, 0), (0, Cp - Cout))).astype(jnp.bfloat16)
    b_pad = jnp.pad(b_fused, (0, Cp - Cout)).reshape(1, Cp).astype(jnp.float32)
    # self.decay.data.clamp_(0, 1): clamp once here (forward/eval only).
    # TODO(synk): PyTorch writes the clamp back into the parameter in-place;
    #             training-mode write-back is out of scope for this kernel.
    d_pad = jnp.pad(jnp.clip(decay.reshape(-1), 0.0, 1.0),
                    (0, Cp - Cout)).reshape(1, Cp).astype(jnp.float32)
    return w_taps, b_pad, d_pad


# ------------------------------ Pallas kernel ------------------------------- #
def _make_mem_relu_kernel(Wp, M):
    """Wp = W + 1 (zero-padded row width), M = H * Wp (pixels incl. fake column)."""
    def kernel(x_ref, w_ref, b_ref, d_ref, mem0_ref, out_ref, mem_ref):
        # x_ref:    (1, 1, (H+2)*Wp + 2, Cin) bf16 -- H zero-padded rows, one
        #           trailing zero column per row, row-major flattened, plus a
        #           1-element zero halo at each end.
        # w_ref:    (3, 3*Cin, Cp) bf16.  b_ref/d_ref: (1, Cp) f32.
        # mem0_ref: (1, M, Cp) f32 carried-in membrane (resident across T).
        # out_ref:  (1, 1, M, Cp) bf16 relu output for this timestep.
        # mem_ref:  (1, M, Cp) f32 membrane -- VMEM-resident accumulator across
        #           the T grid axis (output block index constant over t).
        t = pl.program_id(1)

        @pl.when(t == 0)
        def _():
            mem_ref[...] = mem0_ref[...]     # is_first / carried state init

        # 3x3 conv as 3 deep matmuls: for each kh, concatenate the three
        # kw-shifted contiguous windows into an (M, 3*Cin) bf16 slab and do one
        # K=3*Cin MXU contraction.  Row wraps of the kw=0/kw=2 taps hit the
        # per-row zero column, so no edge masks are needed.
        acc = None
        for kh in range(3):
            base = kh * Wp
            slab = jnp.concatenate(
                [x_ref[0, 0, base + kw:base + kw + M, :] for kw in range(3)],
                axis=-1)                                        # (M, 3*Cin) bf16
            part = jnp.dot(slab, w_ref[kh],
                           preferred_element_type=jnp.float32)  # (M, Cp) f32
            acc = part if acc is None else acc + part

        # mem = mem * decay + (conv + bias); out = relu(mem).  Bias folded into
        # the single fused epilogue pass.
        mem = mem_ref[0] * d_ref[...] + acc + b_ref[...]
        mem_ref[0] = mem
        out_ref[0, 0] = jnp.maximum(mem, 0.0).astype(out_ref.dtype)
    return kernel


# --------------------------- fused timestep sequence ------------------------- #
def mem_relu_sequence(x_seq_nhwc, w_taps, b_pad, d_pad, mem_init):
    """Run T Mem_Relu timesteps in one pallas_call (membrane kept VMEM-resident).

    x_seq_nhwc: (T, N, H, W, Cin) activations (f32 or bf16).
    w_taps:     (3, 3*Cin, Cp) bf16 fused conv+bn weights.
    b_pad:      (1, Cp) f32 fused bias.   d_pad: (1, Cp) f32 clamped decay.
    mem_init:   (N, H*(W+1), Cp) f32 carried membrane (zeros when is_first).
    Returns:
      out_seq:   (T, N, H*(W+1), Cp) bf16  -- relu(mem) per timestep.
      mem_final: (N, H*(W+1), Cp)  f32     -- membrane after the last timestep
                 (carry this to the next call; mem_init is aliased onto it).
    The w == W "fake" column and channels >= Cout are padding; slice them away
    at the model boundary (flat_to_nchw below).
    """
    T, N, H, W, Cin = x_seq_nhwc.shape
    Wp = W + 1
    M = H * Wp
    Lp = (H + 2) * Wp + 2
    _, K3, Cp = w_taps.shape
    assert K3 == 3 * Cin
    assert mem_init.shape == (N, M, Cp)

    # Conv padding baked into the layout: one zero row top/bottom, one trailing
    # zero column per row, row-flattened, plus a 1-element halo so every tap is
    # a contiguous static slice.  bf16 halves HBM/VMEM traffic of the matmul lhs.
    xp = jnp.pad(x_seq_nhwc, ((0, 0), (0, 0), (1, 1), (0, 1), (0, 0)))
    xg = jnp.pad(xp.reshape(T, N, (H + 2) * Wp, Cin), ((0, 0), (0, 0), (1, 1), (0, 0)))
    xg = xg.astype(jnp.bfloat16)                                  # (T, N, Lp, Cin)

    kernel = _make_mem_relu_kernel(Wp, M)
    out_seq, mem_final = pl.pallas_call(
        kernel,
        grid=(N, T),                              # T innermost: membrane carry
        in_specs=[
            pl.BlockSpec((1, 1, Lp, Cin), lambda n, t: (t, n, 0, 0)),   # x[t, n]
            pl.BlockSpec((3, K3, Cp), lambda n, t: (0, 0, 0)),          # weights (resident)
            pl.BlockSpec((1, Cp), lambda n, t: (0, 0)),                 # bias    (resident)
            pl.BlockSpec((1, Cp), lambda n, t: (0, 0)),                 # decay   (resident)
            pl.BlockSpec((1, M, Cp), lambda n, t: (n, 0, 0)),           # mem_init (per image)
        ],
        out_specs=(
            pl.BlockSpec((1, 1, M, Cp), lambda n, t: (t, n, 0, 0)),     # relu(mem) each t
            pl.BlockSpec((1, M, Cp), lambda n, t: (n, 0, 0)),           # membrane: resident
        ),                                                              #   across T, written
        out_shape=(                                                     #   once per image
            jax.ShapeDtypeStruct((T, N, M, Cp), jnp.bfloat16),
            jax.ShapeDtypeStruct((N, M, Cp), jnp.float32),
        ),
        input_output_aliases={4: 1},              # in-place membrane update
        compiler_params=pltpu.CompilerParams(
            dimension_semantics=("parallel", "arbitrary"),   # images || , time sequential
            vmem_limit_bytes=48 * 1024 * 1024),
    )(xg, w_taps, b_pad, d_pad, mem_init)
    return out_seq, mem_final


# --------------------------- layout boundary helpers ------------------------- #
def nchw_to_nhwc_seq(x_seq_nchw):
    return jnp.transpose(x_seq_nchw, (0, 1, 3, 4, 2))


def flat_to_nchw(flat, H, W, Cout):
    """(..., H*(W+1), Cp) -> (..., Cout, H, W); drops fake column + padded channels."""
    lead = flat.shape[:-2]
    x = flat.reshape(*lead, H, W + 1, flat.shape[-1])[..., :W, :Cout]
    return jnp.moveaxis(x.astype(jnp.float32), -1, -3)


# ------------------------------- demo / check -------------------------------- #
if __name__ == "__main__":
    key = jax.random.PRNGKey(0)
    T, N, Cin, Cout, H, W = 3, 2, 8, 16, 16, 16
    ks = jax.random.split(key, 8)

    # Deterministic synthetic parameters (shapes from Mem_Relu.__init__).
    x_seq = jax.random.normal(ks[0], (T, N, Cin, H, W), jnp.float32)
    w = 0.1 * jax.random.normal(ks[1], (Cout, Cin, 3, 3), jnp.float32)     # conv1.weight
    bias = 0.1 * jax.random.normal(ks[2], (Cout,), jnp.float32)            # conv1.bias
    gamma = 1.0 + 0.1 * jax.random.normal(ks[3], (Cout,), jnp.float32)     # bn.weight
    beta = 0.1 * jax.random.normal(ks[4], (Cout,), jnp.float32)            # bn.bias
    r_mean = 0.1 * jax.random.normal(ks[5], (Cout,), jnp.float32)          # bn.running_mean
    r_var = jnp.abs(1.0 + 0.1 * jax.random.normal(ks[6], (Cout,), jnp.float32))
    decay = 0.5 * jnp.ones((Cout, 1, 1), jnp.float32)                      # decay param

    w_taps, b_pad, d_pad = prepare_mem_relu_params(
        w, bias, gamma, beta, r_mean, r_var, decay)
    Cp = b_pad.shape[-1]
    M = H * (W + 1)

    # NCHW <-> NHWC conversion once at the model boundary.
    x_seq_nhwc = nchw_to_nhwc_seq(x_seq)
    mem0 = jnp.zeros((N, M, Cp), jnp.float32)      # param['is_first'] -> zero membrane

    run = jax.jit(mem_relu_sequence)
    out_seq_f, mem_final = run(x_seq_nhwc, w_taps, b_pad, d_pad, mem0)
    jax.block_until_ready((out_seq_f, mem_final))

    out_seq = flat_to_nchw(out_seq_f, H, W, Cout)       # (T, N, Cout, H, W) f32
    mem_f_nchw = flat_to_nchw(mem_final, H, W, Cout)

    # pure-JAX f32 reference (eval-mode fused conv+bn, same per-step semantics)
    def ref_sequence(x_seq_nchw):
        scale = gamma / jnp.sqrt(r_var + 1e-5)
        wf = w * scale[:, None, None, None]
        bf = beta + (bias - r_mean) * scale
        d = jnp.clip(decay.reshape(-1), 0.0, 1.0)[None, :, None, None]
        mem = jnp.zeros((N, Cout, H, W), jnp.float32)
        outs = []
        for t in range(T):
            conv = lax.conv_general_dilated(
                x_seq_nchw[t], wf, window_strides=(1, 1), padding=((1, 1), (1, 1)),
                dimension_numbers=("NCHW", "OIHW", "NCHW"),
                precision=lax.Precision.HIGHEST) + bf[None, :, None, None]
            mem = mem * d + conv
            outs.append(jnp.maximum(mem, 0.0))
        return jnp.stack(outs), mem

    ref_out, ref_mem = ref_sequence(x_seq)

    # bf16 MXU operands / bf16 out vs f32 HIGHEST reference -> relaxed tolerance.
    assert jnp.allclose(out_seq, ref_out, atol=5e-2, rtol=5e-2)
    assert jnp.allclose(mem_f_nchw, ref_mem, atol=5e-2, rtol=5e-2)
    # Padded output channels of the carried membrane must stay exactly zero
    # (relies on weights, bias AND decay all being zero-padded).
    assert jnp.all(mem_final[:, :, Cout:] == 0.0)

    # TODO(synk): BatchNorm training-mode (batch-statistics) branch and
    #             ActFun_changeable's surrogate gradient are training-only and
    #             not part of this forward kernel.
    print("KERNEL_OK")
</pallas_src>

<mosaic_0001>
module attributes {stable_mosaic.version = 11 : i64} {
  func.func @kernel(%arg0: i32, %arg1: i32, %arg2: memref<1x1x308x8xbf16, #tpu.memory_space<vmem>>, %arg3: memref<3x24x128xbf16, #tpu.memory_space<vmem>>, %arg4: memref<1x128xf32, #tpu.memory_space<vmem>>, %arg5: memref<1x128xf32, #tpu.memory_space<vmem>>, %arg6: memref<1x272x128xf32, #tpu.memory_space<vmem>>, %arg7: memref<1x1x272x128xbf16, #tpu.memory_space<vmem>>, %arg8: memref<1x272x128xf32, #tpu.memory_space<vmem>>) attributes {dimension_semantics = [#tpu.dimension_semantics<parallel>, #tpu.dimension_semantics<arbitrary>], iteration_bounds = array<i64: 2, 3>, scalar_prefetch = 0 : i64, scratch_operands = 0 : i64, tpu.core_type = #tpu.core_type<tc>, window_params = [{transform_indices = @transform_0, window_bounds = array<i64: 1, 1, 308, 8>}, {pipeline_mode = #tpu.pipeline_mode<synchronous>, transform_indices = @transform_1, window_bounds = array<i64: 3, 24, 128>}, {pipeline_mode = #tpu.pipeline_mode<synchronous>, transform_indices = @transform_2, window_bounds = array<i64: 1, 128>}, {pipeline_mode = #tpu.pipeline_mode<synchronous>, transform_indices = @transform_3, window_bounds = array<i64: 1, 128>}, {transform_indices = @transform_4, window_bounds = array<i64: 1, 272, 128>}, {transform_indices = @transform_5, window_bounds = array<i64: 1, 1, 272, 128>}, {transform_indices = @transform_6, window_bounds = array<i64: 1, 272, 128>}]} {
    %c0_i32 = arith.constant 0 : i32
    %0 = arith.cmpi eq, %arg1, %c0_i32 : i32
    %1 = arith.extui %0 : i1 to i32
    %c0_i32_0 = arith.constant 0 : i32
    %2 = arith.cmpi ne, %1, %c0_i32_0 : i32
    scf.if %2 {
      %c0_54 = arith.constant 0 : index
      %c0_55 = arith.constant 0 : index
      %c0_56 = arith.constant 0 : index
      %53 = vector.load %arg6[%c0_54, %c0_55, %c0_56] : memref<1x272x128xf32, #tpu.memory_space<vmem>>, vector<1x272x128xf32>
      %c0_57 = arith.constant 0 : index
      %c0_58 = arith.constant 0 : index
      %c0_59 = arith.constant 0 : index
      %54 = vector.load %arg8[%c0_57, %c0_58, %c0_59] : memref<1x272x128xf32, #tpu.memory_space<vmem>>, vector<1x272x128xf32>
      tpu.vector_store %arg8[%c0_57, %c0_58, %c0_59], %53 {strides = array<i32>} : memref<1x272x128xf32, #tpu.memory_space<vmem>>, vector<1x272x128xf32>,
    } else {
    }
    %c0 = arith.constant 0 : index
    %c0_1 = arith.constant 0 : index
    %c0_2 = arith.constant 0 : index
    %c0_3 = arith.constant 0 : index
    %3 = vector.load %arg2[%c0, %c0_1, %c0_2, %c0_3] : memref<1x1x308x8xbf16, #tpu.memory_space<vmem>>, vector<1x1x272x8xbf16>
    %4 = vector.shape_cast %3 : vector<1x1x272x8xbf16> to vector<272x8xbf16>
    %c0_4 = arith.constant 0 : index
    %c0_5 = arith.constant 0 : index
    %c1 = arith.constant 1 : index
    %c0_6 = arith.constant 0 : index
    %5 = vector.load %arg2[%c0_4, %c0_5, %c1, %c0_6] : memref<1x1x308x8xbf16, #tpu.memory_space<vmem>>, vector<1x1x272x8xbf16>
    %6 = vector.shape_cast %5 : vector<1x1x272x8xbf16> to vector<272x8xbf16>
    %c0_7 = arith.constant 0 : index
    %c0_8 = arith.constant 0 : index
    %c2 = arith.constant 2 : index
    %c0_9 = arith.constant 0 : index
    %7 = vector.load %arg2[%c0_7, %c0_8, %c2, %c0_9] : memref<1x1x308x8xbf16, #tpu.memory_space<vmem>>, vector<1x1x272x8xbf16>
    %8 = vector.shape_cast %7 : vector<1x1x272x8xbf16> to vector<272x8xbf16>
    %9 = tpu.concatenate %4, %6, %8 in 1 : vector<272x8xbf16>, vector<272x8xbf16>, vector<272x8xbf16> -> vector<272x24xbf16>
    %c0_10 = arith.constant 0 : index
    %c0_11 = arith.constant 0 : index
    %c0_12 = arith.constant 0 : index
    %10 = vector.load %arg3[%c0_10, %c0_11, %c0_12] : memref<3x24x128xbf16, #tpu.memory_space<vmem>>, vector<1x24x128xbf16>
    %11 = vector.shape_cast %10 : vector<1x24x128xbf16> to vector<24x128xbf16>
    %cst = arith.constant dense<0.000000e+00> : vector<272x128xf32>
    %12 = tpu.matmul %9, %11, %cst {dimension_numbers = #tpu.dot_dimension_numbers<[1], [0], [0], [1], [0, 0, 1, 1], [], []>} : vector<272x24xbf16>, vector<24x128xbf16>, vector<272x128xf32> -> vector<272x128xf32>
    %c0_13 = arith.constant 0 : index
    %c0_14 = arith.constant 0 : index
    %c17 = arith.constant 17 : index
    %c0_15 = arith.constant 0 : index
    %13 = vector.load %arg2[%c0_13, %c0_14, %c17, %c0_15] : memref<1x1x308x8xbf16, #tpu.memory_space<vmem>>, vector<1x1x272x8xbf16>
    %14 = vector.shape_cast %13 : vector<1x1x272x8xbf16> to vector<272x8xbf16>
    %c0_16 = arith.constant 0 : index
    %c0_17 = arith.constant 0 : index
    %c18 = arith.constant 18 : index
    %c0_18 = arith.constant 0 : index
    %15 = vector.load %arg2[%c0_16, %c0_17, %c18, %c0_18] : memref<1x1x308x8xbf16, #tpu.memory_space<vmem>>, vector<1x1x272x8xbf16>
    %16 = vector.shape_cast %15 : vector<1x1x272x8xbf16> to vector<272x8xbf16>
    %c0_19 = arith.constant 0 : index
    %c0_20 = arith.constant 0 : index
    %c19 = arith.constant 19 : index
    %c0_21 = arith.constant 0 : index
    %17 = vector.load %arg2[%c0_19, %c0_20, %c19, %c0_21] : memref<1x1x308x8xbf16, #tpu.memory_space<vmem>>, vector<1x1x272x8xbf16>
    %18 = vector.shape_cast %17 : vector<1x1x272x8xbf16> to vector<272x8xbf16>
    %19 = tpu.concatenate %14, %16, %18 in 1 : vector<272x8xbf16>, vector<272x8xbf16>, vector<272x8xbf16> -> vector<272x24xbf16>
    %c1_22 = arith.constant 1 : index
    %c0_23 = arith.constant 0 : index
    %c0_24 = arith.constant 0 : index
    %20 = vector.load %arg3[%c1_22, %c0_23, %c0_24] : memref<3x24x128xbf16, #tpu.memory_space<vmem>>, vector<1x24x128xbf16>
    %21 = vector.shape_cast %20 : vector<1x24x128xbf16> to vector<24x128xbf16>
    %cst_25 = arith.constant dense<0.000000e+00> : vector<272x128xf32>
    %22 = tpu.matmul %19, %21, %cst_25 {dimension_numbers = #tpu.dot_dimension_numbers<[1], [0], [0], [1], [0, 0, 1, 1], [], []>} : vector<272x24xbf16>, vector<24x128xbf16>, vector<272x128xf32> -> vector<272x128xf32>
    %23 = arith.addf %12, %22 : vector<272x128xf32>
    %c0_26 = arith.constant 0 : index
    %c0_27 = arith.constant 0 : index
    %c34 = arith.constant 34 : index
    %c0_28 = arith.constant 0 : index
    %24 = vector.load %arg2[%c0_26, %c0_27, %c34, %c0_28] : memref<1x1x308x8xbf16, #tpu.memory_space<vmem>>, vector<1x1x272x8xbf16>
    %25 = vector.shape_cast %24 : vector<1x1x272x8xbf16> to vector<272x8xbf16>
    %c0_29 = arith.constant 0 : index
    %c0_30 = arith.constant 0 : index
    %c35 = arith.constant 35 : index
    %c0_31 = arith.constant 0 : index
    %26 = vector.load %arg2[%c0_29, %c0_30, %c35, %c0_31] : memref<1x1x308x8xbf16, #tpu.memory_space<vmem>>, vector<1x1x272x8xbf16>
    %27 = vector.shape_cast %26 : vector<1x1x272x8xbf16> to vector<272x8xbf16>
    %c0_32 = arith.constant 0 : index
    %c0_33 = arith.constant 0 : index
    %c36 = arith.constant 36 : index
    %c0_34 = arith.constant 0 : index
    %28 = vector.load %arg2[%c0_32, %c0_33, %c36, %c0_34] : memref<1x1x308x8xbf16, #tpu.memory_space<vmem>>, vector<1x1x272x8xbf16>
    %29 = vector.shape_cast %28 : vector<1x1x272x8xbf16> to vector<272x8xbf16>
    %30 = tpu.concatenate %25, %27, %29 in 1 : vector<272x8xbf16>, vector<272x8xbf16>, vector<272x8xbf16> -> vector<272x24xbf16>
    %c2_35 = arith.constant 2 : index
    %c0_36 = arith.constant 0 : index
    %c0_37 = arith.constant 0 : index
    %31 = vector.load %arg3[%c2_35, %c0_36, %c0_37] : memref<3x24x128xbf16, #tpu.memory_space<vmem>>, vector<1x24x128xbf16>
    %32 = vector.shape_cast %31 : vector<1x24x128xbf16> to vector<24x128xbf16>
    %cst_38 = arith.constant dense<0.000000e+00> : vector<272x128xf32>
    %33 = tpu.matmul %30, %32, %cst_38 {dimension_numbers = #tpu.dot_dimension_numbers<[1], [0], [0], [1], [0, 0, 1, 1], [], []>} : vector<272x24xbf16>, vector<24x128xbf16>, vector<272x128xf32> -> vector<272x128xf32>
    %34 = arith.addf %23, %33 : vector<272x128xf32>
    %c0_39 = arith.constant 0 : index
    %c0_40 = arith.constant 0 : index
    %c0_41 = arith.constant 0 : index
    %35 = vector.load %arg8[%c0_39, %c0_40, %c0_41] : memref<1x272x128xf32, #tpu.memory_space<vmem>>, vector<1x272x128xf32>
    %36 = vector.shape_cast %35 : vector<1x272x128xf32> to vector<272x128xf32>
    %c0_42 = arith.constant 0 : index
    %c0_43 = arith.constant 0 : index
    %37 = vector.load %arg5[%c0_42, %c0_43] : memref<1x128xf32, #tpu.memory_space<vmem>>, vector<1x128xf32>
    %38 = vector.broadcast %37 : vector<1x128xf32> to vector<272x128xf32>
    %39 = arith.mulf %36, %38 : vector<272x128xf32>
    %40 = arith.addf %39, %34 : vector<272x128xf32>
    %c0_44 = arith.constant 0 : index
    %c0_45 = arith.constant 0 : index
    %41 = vector.load %arg4[%c0_44, %c0_45] : memref<1x128xf32, #tpu.memory_space<vmem>>, vector<1x128xf32>
    %42 = vector.broadcast %41 : vector<1x128xf32> to vector<272x128xf32>
    %43 = arith.addf %40, %42 : vector<272x128xf32>
    %c0_46 = arith.constant 0 : index
    %c0_47 = arith.constant 0 : index
    %c0_48 = arith.constant 0 : index
    %44 = vector.load %arg8[%c0_46, %c0_47, %c0_48] : memref<1x272x128xf32, #tpu.memory_space<vmem>>, vector<1x272x128xf32>
    %45 = vector.shape_cast %44 : vector<1x272x128xf32> to vector<272x128xf32>
    %46 = vector.shape_cast %43 : vector<272x128xf32> to vector<1x272x128xf32>
    tpu.vector_store %arg8[%c0_46, %c0_47, %c0_48], %46 {strides = array<i32>} : memref<1x272x128xf32, #tpu.memory_space<vmem>>, vector<1x272x128xf32>,
    %cst_49 = arith.constant 0.000000e+00 : f32
    %47 = vector.broadcast %cst_49 : f32 to vector<272x128xf32>
    %48 = arith.maximumf %43, %47 : vector<272x128xf32>
    %49 = arith.truncf %48 : vector<272x128xf32> to vector<272x128xbf16>
    %c0_50 = arith.constant 0 : index
    %c0_51 = arith.constant 0 : index
    %c0_52 = arith.constant 0 : index
    %c0_53 = arith.constant 0 : index
    %50 = vector.load %arg7[%c0_50, %c0_51, %c0_52, %c0_53] : memref<1x1x272x128xbf16, #tpu.memory_space<vmem>>, vector<1x1x272x128xbf16>
    %51 = vector.shape_cast %50 : vector<1x1x272x128xbf16> to vector<272x128xbf16>
    %52 = vector.shape_cast %49 : vector<272x128xbf16> to vector<1x1x272x128xbf16>
    tpu.vector_store %arg7[%c0_50, %c0_51, %c0_52, %c0_53], %52 {strides = array<i32>} : memref<1x1x272x128xbf16, #tpu.memory_space<vmem>>, vector<1x1x272x128xbf16>,
    return
  }
  func.func @transform_0(%arg0: i32, %arg1: i32) -> (i32, i32, i32, i32) {
    %c0_i32 = arith.constant 0 : i32
    %c0_i32_0 = arith.constant 0 : i32
    %c0_i32_1 = arith.constant 0 : i32
    return %arg1, %arg0, %c0_i32, %c0_i32_0 : i32, i32, i32, i32
  }
  func.func @transform_1(%arg0: i32, %arg1: i32) -> (i32, i32, i32) {
    %c0_i32 = arith.constant 0 : i32
    %c0_i32_0 = arith.constant 0 : i32
    %c0_i32_1 = arith.constant 0 : i32
    %c0_i32_2 = arith.constant 0 : i32
    return %c0_i32, %c0_i32_0, %c0_i32_1 : i32, i32, i32
  }
  func.func @transform_2(%arg0: i32, %arg1: i32) -> (i32, i32) {
    %c0_i32 = arith.constant 0 : i32
    %c0_i32_0 = arith.constant 0 : i32
    %c0_i32_1 = arith.constant 0 : i32
    return %c0_i32, %c0_i32_0 : i32, i32
  }
  func.func @transform_3(%arg0: i32, %arg1: i32) -> (i32, i32) {
    %c0_i32 = arith.constant 0 : i32
    %c0_i32_0 = arith.constant 0 : i32
    %c0_i32_1 = arith.constant 0 : i32
    return %c0_i32, %c0_i32_0 : i32, i32
  }
  func.func @transform_4(%arg0: i32, %arg1: i32) -> (i32, i32, i32) {
    %c0_i32 = arith.constant 0 : i32
    %c0_i32_0 = arith.constant 0 : i32
    %c0_i32_1 = arith.constant 0 : i32
    return %arg0, %c0_i32, %c0_i32_0 : i32, i32, i32
  }
  func.func @transform_5(%arg0: i32, %arg1: i32) -> (i32, i32, i32, i32) {
    %c0_i32 = arith.constant 0 : i32
    %c0_i32_0 = arith.constant 0 : i32
    %c0_i32_1 = arith.constant 0 : i32
    return %arg1, %arg0, %c0_i32, %c0_i32_0 : i32, i32, i32, i32
  }
  func.func @transform_6(%arg0: i32, %arg1: i32) -> (i32, i32, i32) {
    %c0_i32 = arith.constant 0 : i32
    %c0_i32_0 = arith.constant 0 : i32
    %c0_i32_1 = arith.constant 0 : i32
    return %arg0, %c0_i32, %c0_i32_0 : i32, i32, i32
  }
}

</mosaic_0001>

<bundles_post_ra>
// kernel: mem_relu_sequence.1
= control target key start
LH: loop header
LB: loop body
LE: loop exit
PB: predicated region body
PF: predicated region fallthrough
CT: control target
= control target key end

     0   :  { %s5286_s0 = inlined_call_operand.vmem [shape: bf16[3,2,308,8], index: 0, kind: input, shape index: {}]   ;;  %s5287_s1 = inlined_call_operand.vmem [shape: bf16[3,24,128], index: 1, kind: input, shape index: {}]   ;;  %s5288_s2 = inlined_call_operand.vmem [shape: f32[1,128], index: 2, kind: input, shape index: {}]   ;;  %s5289_s3 = inlined_call_operand.vmem [shape: f32[1,128], index: 3, kind: input, shape index: {}]   ;;  %s5290_s4 = inlined_call_operand.hbm [shape: f32[2,272,128], index: 4, kind: input, shape index: {}, may-alias: {4,6}]   ;;  %s5291_s5 = inlined_call_operand.hbm [shape: bf16[3,2,272,128], index: 5, kind: output, shape index: {0}]   ;;  %s5292_s6 = inlined_call_operand.hbm [shape: f32[2,272,128], index: 6, kind: output, shape index: {1}, may-alias: {4,6}]  }
   0x1   :  { %5306 = sst [smem:[#allocation22_spill]] %s5290_s4 }
   0x2   :  { %12 = vsyncpa [#allocation3], 0 }
   0x3   :  { %14 = vsyncpa [#allocation3 + $0x1], 0 }
   0x4   :  { %15 = vsyncpa [#allocation4], 0 }
   0x5   :  { %17 = vsyncpa [#allocation4 + $0x1], 0 }
   0x6   :  { %18 = vsyncpa [#allocation7], 0 }
   0x7   :  { %20 = vsyncpa [#allocation7 + $0x1], 0  ;;  %s3818_s21 = smov 0   ;;  %s3820_s22 = smov 0  }
   0x8   :  { %s3822_s23 = smov 0   ;;  %s3824_s24 = smov 0  }
   0x9   :  { %s3826_s25 = smov 0   ;;  %s3828_s26 = smov 0  }
   0xa   :  { %s3830_s27 = smov 0   ;;  %s3832_s28 = smov 0  }
   0xb   :  { %s3834_s29 = smov 0   ;;  %s3836_s30 = smov 0  }
   0xc   :  { %s3838_s7 = smov 0  }
   0xd LB: > { %5307 = sst [smem:[#allocation11_spill]] %s3737_s23  ;;  %s2844_s8 = sadd.s32 4294967295, %s3769_s7   ;;  %s3769_s7 = sphi %s3838_s7, %s26_s7   ;;  %s3765_s30 = sphi %s3836_s30, %s5342_s30   ;;  %s3761_s29 = sphi %s3834_s29, %s5341_s29   ;;  %s3757_s28 = sphi %s3832_s28, %s5340_s28   ;;  %s3753_s27 = sphi %s3830_s27, %s5339_s27   ;;  %s3749_s26 = sphi %s3828_s26, %s5338_s26   ;;  %s3745_s25 = sphi %s3826_s25, %s5337_s25   ;;  %s3741_s24 = sphi %s3824_s24, %s5336_s24   ;;  %s3737_s23 = sphi %s3822_s23, %s5335_s23   ;;  %s3733_s22 = sphi %s3820_s22, %s5344_s22   ;;  %s3729_s21 = sphi %s3818_s21, %s5343_s21  }
   0xe   : > { %5308 = sst [smem:[#allocation12_spill]] %s3745_s25  ;;  %s2845_s9 = sadd.s32 4294967294, %s3769_s7  }
   0xf   : > { %5309 = sst [smem:[#allocation13_spill]] %s3749_s26  ;;  %s35_s10 = sadd.s32 1, %s3761_s29 }
  0x10   : > { %5310 = sst [smem:[#allocation14_spill]] %s3761_s29  ;;  %s38_s11 = sadd.s32 1, %s3765_s30 }
  0x11   : > { %5311 = sst [smem:[#allocation15_spill]] %s3765_s30  ;;  %p36_p0 = scmp.ge.s32.totalorder %s35_s10, 3 }
  0x12   : > { %s136_s12 = sadd.s32 1, %s3749_s26  ;;  %p143_p1 = scmp.ne.s32.totalorder %s3749_s26, %s3745_s25 }
  0x13   : > { %p144_p2 = scmp.eq.s32.totalorder %s3769_s7, 0  ;;  %s5346_s10 = smov (%p36_p0, %s35_s10), 0 }
  0x14   : > { %5312 = sst [smem:[#allocation16_spill]] %s5346_s10  ;;  %s5348_s11 = smov (!%p36_p0, %s38_s11), %s3765_s30 }
  0x15   : > { %p3887_p3 = por %p144_p2, %p143_p1  ;;  %p149_p4 = scmp.ne.s32.totalorder %s3745_s25, %s3741_s24 }
  0x16   : > { %p40_p5 = scmp.ge.s32.totalorder %s5348_s11, 2  ;;  %p150_p6 = scmp.eq.s32.totalorder %s2844_s8, 0 }
  0x17   : > { %s159_s14 = ssub.s32 %s3761_s29, %s5346_s10  ;;  %s164_s15 = sadd.s32 1, %s3737_s23 }
  0x18   : > { %s5350_s11 = smov (%p40_p5, %s5348_s11), 0  ;;  %p3901_p7 = por %p150_p6, %p149_p4 }
  0x19   : > { %5314 = sst [smem:[#allocation17_spill]] %s5350_s11  ;;  %p174_p8 = scmp.ne.s32.totalorder %s3737_s23, %s3733_s22 }
  0x1a   : > { %s133_s17 = ssub.s32 %s3765_s30, %s5350_s11  ;;  %p175_p9 = scmp.eq.s32.totalorder %s2844_s8, 5 }
  0x1b   : > { %p134_p10 = scmp.eq.s32.totalorder %s133_s17, 0  ;;  %s161_s18 = sor.u32 %s159_s14, %s133_s17 }
  0x1c   : > { %p162_p11 = scmp.eq.s32.totalorder %s161_s18, 0  ;;  %p3909_p12 = por %p175_p9, %p174_p8 }
  0x1d   : > { %s3914_s20 = scalar_select %p134_p10, %s3749_s26, %s136_s12  }
  0x1e   : > { %s5316_s19 = scalar_select %p3909_p12, 1, 0 }
  0x1f   : > { %5317 = sst [smem:[#allocation18_spill]] %s3914_s20  ;;  %p180_p13 = scmp.ne.s32.totalorder %s3733_s22, %s3729_s21 }
  0x20   : > { %s3917_s10 = scalar_select %p162_p11, %s3737_s23, %s164_s15  }
  0x21   : > { %p181_p0 = scmp.eq.s32.totalorder %s2845_s9, 5  ;;  %p3924_p2 = por %p175_p9, %p143_p1 }
  0x22   : > { %5318 = sst [smem:[#allocation19_spill]] %s3917_s10  ;;  %p3436_p8 = scmp.lt.s32.totalorder %s3769_s7, 6 }
  0x23   : > { %s5319_s11 = scalar_select %p3924_p2, 1, 0 }
  0x24   : > { %p3928_p5 = por %p181_p0, %p180_p13  ;;  %p3935_p6 = por %p181_p0, %p149_p4 }
  0x25   : > { %s248_s12 = sand.u32 1, %s3749_s26   ;;  %s3411_s17 = smul.u32 4352, %s3765_s30 }
  0x26   : > { %s5320_s8 = scalar_select %p3928_p5, 1, 0 }
  0x27   : > { %s5321_s14 = scalar_select %p3935_p6, 1, 0 }
  0x28   : > { %s3410_s15 = smul.u32 272, %s248_s12  ;;  %p3944_p10 = pnand %p3436_p8, %p3887_p3 }
  0x29   : > { %5322 = sst [smem:[#allocation20_spill]] %s5321_s14  ;;  %s5324_s4 = sld [smem:[#allocation22_spill]] }
  0x2a   : > { %s252_s10 = scalar_lea.vmem [#allocation2], %s3410_s15  ;;  %s3956_s13 = scalar_lea.sflag [#allocation3], %s248_s12 }
  0x2b   : > { %s259_s26 = sshll.u32 %s252_s10, 4  ;;  %p3587_p4 = pneg %p3944_p10  ;;  %s3953_s26 = int_to_ptr.vmem [resolvable:$true] %s259_s26 }
  0x2f   : > { %s3951_s20 = scalar_lea.hbm %s5324_s4, %s3411_s17  ;;  %s3590_s18 = scalar_lea.hbm %s5324_s4, 8704 }
  0x30   : > { %s3585_s30 = scalar_lea.hbm %s3951_s20, 4352  ;;  %p3591_p13 = scmp.lt.u32.totalorder %s3951_s20, %s5324_s4 }
  0x31   : > { %p3586_p3 = scmp.ne.s32.totalorder %s3951_s20, %s3585_s30  ;;  %p3592_p0 = scmp.lt.u32.totalorder %s3590_s18, %s3585_s30 }
  0x32   : > { %p3594_p1 = scmp.lt.u32.totalorder %s3585_s30, %s3951_s20 }
  0x33   : > { %p3588_p9 = pnand %p3587_p4, %p3586_p3  ;;  %p3593_p8 = por %p3592_p0, %p3591_p13 }
  0x35   : > { %p3589_p11 = pneg %p3588_p9  ;;  %p3595_p6 = por %p3594_p1, %p3593_p8 }
  0x37   : > { %p3596_p5 = pnand %p3595_p6, %p3589_p11 }
  0x39   : > { %3599 = shalt.err (!%p3596_p5)
}
  0x3a   : > { %s3600_s10 = scalar_lea.vmem %s3953_s26, 4352  ;;  %s3771_s12 = smov [#allocation2]  }
  0x3b   : > { %p3601_p3 = scmp.ne.s32.totalorder %s3953_s26, %s3600_s10  ;;  %s3605_s29 = sshll.u32 %s3771_s12, 4  ;;  %s3606_s29 = int_to_ptr.vmem [resolvable:$false] %s3605_s29 }
  0x3c   : > { %s3607_s23 = scalar_lea.vmem %s3606_s29, 8704  ;;  %p3608_p2 = scmp.lt.s32.totalorder %s3953_s26, %s3606_s29 }
  0x3d   : > { %p3603_p9 = pnand %p3601_p3, %p3587_p4  ;;  %p3609_p13 = scmp.lt.s32.totalorder %s3607_s23, %s3600_s10 }
  0x3f   : > { %p3604_p12 = pneg %p3603_p9  ;;  %p3610_p0 = por %p3609_p13, %p3608_p2 }
  0x41   : > { %p3611_p1 = pnand %p3610_p0, %p3604_p12 }
  0x43   : > { %3614 = shalt.err (!%p3611_p1)
}
  0x44   : > { %s3772_s30 = smov 128   ;;  %s3773_s17 = smov 8  }
  0x45   : > { %3428 = dma.hbm_to_vmem [thread:$0]  (!%p3944_p10), %s3951_s20, 4352, %s3953_s26, %s3956_s13, %s3772_s30, %s3772_s30, %s3773_s17  }
  0x46   : > { %p267_p5 = scmp.lt.s32.totalorder %s3769_s7, 7  ;;  %p5325_p6 = scmp.ge.s32.totalorder %s3769_s7, 1 }
  0x48   : > { %p268_p4 = pnand %p5325_p6, %p267_p5 }
  0x4a   : > { %271 = sbr.rel (%p268_p4) target bundleno = 707 (0x2c3), region = 40 }
  0x51   : > { %s3988_s18 = sand.u32 1, %s3745_s25  }
  0x52   : > { %s3412_s15 = smul.u32 272, %s3988_s18  ;;  %s274_s10 = scalar_lea.sflag [#allocation3], %s3988_s18 }
  0x54   : > { %s3992_s12 = scalar_lea.vmem [#allocation2], %s3412_s15 }
  0x55   : > { %3716 = dma.done.wait (%p3901_p7), %s274_s10, 4352  }
  0x56   : > { %3718 = vsyncadd (%p3901_p7), %s274_s10, 4294962944  ;;  %s310_s26 = sand.u32 1, %s3733_s22   ;;  %p320_p12 = scmp.lt.s32.totalorder %s3753_s27, 2 }
  0x57   : > { %s3413_s20 = smul.u32 136, %s310_s26  ;;  %p322_p2 = scmp.lt.s32.totalorder %s3757_s28, 1 }
  0x58   : > { %s321_s9 = scalar_select %p320_p12, %s3753_s27, 2 }
  0x59   : > { %s323_s13 = scalar_select %p322_p2, %s3757_s28, 1 }
  0x5a   : > { %s3415_s29 = smul.u32 78, %s321_s9  ;;  %s4010_s25 = scalar_lea.vmem [#allocation5], %s3413_s20 }
  0x5b   : > { %s3414_s23 = smul.u32 39, %s323_s13  ;;  %s4012_s14 = scalar_lea.vmem [#allocation6], %s3412_s15 }
  0x5c   : > { %p2851_p7 = scmp.ne.s32.totalorder %s3753_s27, 0 }
  0x5d   : > { %s326_s30 = sadd.s32 %s3415_s29, %s3414_s23  ;;  %v334_v0 = vld [vmem:[%s3992_s12] sm:$0xff] (!%p2851_p7)  ;;  %v335_v1 = vld [vmem:[%s3992_s12 + $0x8] sm:$0xff] (!%p2851_p7)  ;;  %v336_v2 = vld [vmem:[%s3992_s12 + $0x10] sm:$0xff] (!%p2851_p7) }
  0x5e   : > { %s2850_s17 = sshll.u32 %s326_s30, 2  ;;  %333 = sbr.rel (%p2851_p7) target bundleno = 111 (0x6f), region = 48  ;;  %368 = vst [vmem:[%s4012_s14] sm:$0xff] (!%p2851_p7), %v334_v0  ;;  %369 = vst [vmem:[%s4012_s14 + $0x8] sm:$0xff] (!%p2851_p7), %v335_v1  ;;  %v337_v3 = vld [vmem:[%s3992_s12 + $0x18] sm:$0xff] (!%p2851_p7)  ;;  %v338_v4 = vld [vmem:[%s3992_s12 + $0x20] sm:$0xff] (!%p2851_p7) }
  0x5f   : > { %s4008_s10 = scalar_lea.vmem %s5286_s0, %s2850_s17  ;;  %370 = vst [vmem:[%s4012_s14 + $0x10] sm:$0xff] (!%p2851_p7), %v336_v2  ;;  %v339_v5 = vld [vmem:[%s3992_s12 + $0x28] sm:$0xff] (!%p2851_p7)  ;;  %371 = vst [vmem:[%s4012_s14 + $0x18] sm:$0xff] (!%p2851_p7), %v337_v3  ;;  %v340_v6 = vld [vmem:[%s3992_s12 + $0x30] sm:$0xff] (!%p2851_p7) }
  0x60   : > { %372 = vst [vmem:[%s4012_s14 + $0x20] sm:$0xff] (!%p2851_p7), %v338_v4  ;;  %373 = vst [vmem:[%s4012_s14 + $0x28] sm:$0xff] (!%p2851_p7), %v339_v5  ;;  %v341_v7 = vld [vmem:[%s3992_s12 + $0x38] sm:$0xff] (!%p2851_p7)  ;;  %v342_v8 = vld [vmem:[%s3992_s12 + $0x40] sm:$0xff] (!%p2851_p7) }
  0x61   : > { %374 = vst [vmem:[%s4012_s14 + $0x30] sm:$0xff] (!%p2851_p7), %v340_v6  ;;  %375 = vst [vmem:[%s4012_s14 + $0x38] sm:$0xff] (!%p2851_p7), %v341_v7  ;;  %v343_v9 = vld [vmem:[%s3992_s12 + $0x48] sm:$0xff] (!%p2851_p7)  ;;  %v344_v10 = vld [vmem:[%s3992_s12 + $0x50] sm:$0xff] (!%p2851_p7) }
  0x62   : > { %376 = vst [vmem:[%s4012_s14 + $0x40] sm:$0xff] (!%p2851_p7), %v342_v8  ;;  %v345_v11 = vld [vmem:[%s3992_s12 + $0x58] sm:$0xff] (!%p2851_p7)  ;;  %377 = vst [vmem:[%s4012_s14 + $0x48] sm:$0xff] (!%p2851_p7), %v343_v9  ;;  %v346_v12 = vld [vmem:[%s3992_s12 + $0x60] sm:$0xff] (!%p2851_p7) }
  0x63   : > { %378 = vst [vmem:[%s4012_s14 + $0x50] sm:$0xff] (!%p2851_p7), %v344_v10  ;;  %379 = vst [vmem:[%s4012_s14 + $0x58] sm:$0xff] (!%p2851_p7), %v345_v11  ;;  %v347_v13 = vld [vmem:[%s3992_s12 + $0x68] sm:$0xff] (!%p2851_p7)  ;;  %v348_v14 = vld [vmem:[%s3992_s12 + $0x70] sm:$0xff] (!%p2851_p7) }
  0x64   : > { %380 = vst [vmem:[%s4012_s14 + $0x60] sm:$0xff] (!%p2851_p7), %v346_v12  ;;  %381 = vst [vmem:[%s4012_s14 + $0x68] sm:$0xff] (!%p2851_p7), %v347_v13  ;;  %v349_v15 = vld [vmem:[%s3992_s12 + $0x78] sm:$0xff] (!%p2851_p7)  ;;  %v350_v16 = vld [vmem:[%s3992_s12 + $0x80] sm:$0xff] (!%p2851_p7) }
  0x65   : > { %382 = vst [vmem:[%s4012_s14 + $0x70] sm:$0xff] %v348_v14  ;;  %v351_v17 = vld [vmem:[%s3992_s12 + $0x88] sm:$0xff]  ;;  %383 = vst [vmem:[%s4012_s14 + $0x78] sm:$0xff] %v349_v15  ;;  %v352_v18 = vld [vmem:[%s3992_s12 + $0x90] sm:$0xff] }
  0x66   : > { %384 = vst [vmem:[%s4012_s14 + $0x80] sm:$0xff] %v350_v16  ;;  %385 = vst [vmem:[%s4012_s14 + $0x88] sm:$0xff] %v351_v17  ;;  %v353_v19 = vld [vmem:[%s3992_s12 + $0x98] sm:$0xff]  ;;  %v354_v20 = vld [vmem:[%s3992_s12 + $0xa0] sm:$0xff] }
  0x67   : > { %386 = vst [vmem:[%s4012_s14 + $0x90] sm:$0xff] %v352_v18  ;;  %387 = vst [vmem:[%s4012_s14 + $0x98] sm:$0xff] %v353_v19  ;;  %v355_v21 = vld [vmem:[%s3992_s12 + $0xa8] sm:$0xff]  ;;  %v356_v22 = vld [vmem:[%s3992_s12 + $0xb0] sm:$0xff] }
  0x68   : > { %388 = vst [vmem:[%s4012_s14 + $0xa0] sm:$0xff] %v354_v20  ;;  %v357_v23 = vld [vmem:[%s3992_s12 + $0xb8] sm:$0xff]  ;;  %389 = vst [vmem:[%s4012_s14 + $0xa8] sm:$0xff] %v355_v21  ;;  %v358_v24 = vld [vmem:[%s3992_s12 + $0xc0] sm:$0xff] }
  0x69   : > { %390 = vst [vmem:[%s4012_s14 + $0xb0] sm:$0xff] %v356_v22  ;;  %391 = vst [vmem:[%s4012_s14 + $0xb8] sm:$0xff] %v357_v23  ;;  %v359_v25 = vld [vmem:[%s3992_s12 + $0xc8] sm:$0xff]  ;;  %v360_v26 = vld [vmem:[%s3992_s12 + $0xd0] sm:$0xff] }
  0x6a   : > { %392 = vst [vmem:[%s4012_s14 + $0xc0] sm:$0xff] %v358_v24  ;;  %393 = vst [vmem:[%s4012_s14 + $0xc8] sm:$0xff] %v359_v25  ;;  %v361_v27 = vld [vmem:[%s3992_s12 + $0xd8] sm:$0xff]  ;;  %v362_v28 = vld [vmem:[%s3992_s12 + $0xe0] sm:$0xff] }
  0x6b   : > { %394 = vst [vmem:[%s4012_s14 + $0xd0] sm:$0xff] %v360_v26  ;;  %v363_v29 = vld [vmem:[%s3992_s12 + $0xe8] sm:$0xff]  ;;  %395 = vst [vmem:[%s4012_s14 + $0xd8] sm:$0xff] %v361_v27  ;;  %v364_v30 = vld [vmem:[%s3992_s12 + $0xf0] sm:$0xff] }
  0x6c   : > { %396 = vst [vmem:[%s4012_s14 + $0xe0] sm:$0xff] %v362_v28  ;;  %397 = vst [vmem:[%s4012_s14 + $0xe8] sm:$0xff] %v363_v29  ;;  %v365_v31 = vld [vmem:[%s3992_s12 + $0xf8] sm:$0xff]  ;;  %v366_v32 = vld [vmem:[%s3992_s12 + $0x100] sm:$0xff] }
  0x6d   : > { %398 = vst [vmem:[%s4012_s14 + $0xf0] sm:$0xff] %v364_v30  ;;  %399 = vst [vmem:[%s4012_s14 + $0xf8] sm:$0xff] %v365_v31  ;;  %v367_v33 = vld [vmem:[%s3992_s12 + $0x108] sm:$0xff] }
  0x6e   : > { %400 = vst [vmem:[%s4012_s14 + $0x100] sm:$0xff] %v366_v32  ;;  %401 = vst [vmem:[%s4012_s14 + $0x108] sm:$0xff] %v367_v33 }
  0x6f PF: > { %v4084_v34 = vld [vmem:[%s4008_s10 + $0x10] sm:$0xff]   ;;  %v4087_v35 = vld [vmem:[%s4008_s10 + $0x18] sm:$0xff]   ;;  %vm704_vm0 = vcmask 1046528   ;;  %v4090_v36 = vld [vmem:[%s4008_s10 + $0xc] sm:$0xf]  ;;  %s3774_s4 = smov 16  }
  0x70   : > { %v850_v37 = vld [vmem:[%s4008_s10 + $0x8] sm:$0xe]  ;;  %v4094_v38 = vrot.slane %v4084_v34, 1  ;;  %v710_v39 = vrot.slane %v4087_v35, 1  ;;  %v4099_v41 = vld [vmem:[%s4008_s10 + $0x50] sm:$0xff]   ;;  %v543_v42 = vshll.u32 %v4084_v34, 16 }
  0x71   : > { %v2873_v40 = vcombine.low %v850_v37, %v4090_v36  ;;  %vm526_vm1 = vsmask.f32 7424  ;;  %v547_v43 = vshrl.u32 %v4084_v34, 16  ;;  %v551_v44 = vshll.u32 %v4087_v35, 16  ;;  %v4105_v45 = vld [vmem:[%s4008_s10 + $0x58] sm:$0xff]   ;;  %v4110_v50 = vld [vmem:[%s4008_s10 + $0x60] sm:$0xff]  }
  0x72   : > { %v711_v46 = vsel %vm704_vm0, %v4094_v38, %v710_v39  ;;  %v4113_v51 = vrot.slane %v543_v42, 1  ;;  %v724_v55 = vrot.slane %v4099_v41, 1  ;;  %v726_v56 = vrot.slane %v4105_v45, 1  ;;  %v4126_v63 = vld [vmem:[%s4008_s10 + $0x20] sm:$0xff]   ;;  %s3775_s15 = smov 8   ;;  %v4144_v12 = vld [vmem:[%s4008_s10 + $0x68] sm:$0xff]  }
  0x73   : > { %v897_v47 = vrot.slane %v2873_v40, 1  ;;  %v864_v48 = vshrl.u32 %v2873_v40, 16  ;;  %v866_v49 = vshll.u32 %v2873_v40, 16  ;;  %744 = vrot.lane.b32.xlu1 %v711_v46, %s3774_s4  ;;  %v553_v52 = vrot.slane %v551_v44, 1  ;;  %v4155_v21 = vld [vmem:[%s4008_s10 + $0x28] sm:$0xff]   ;;  %v4165_v29 = vld [vmem:[%s4008_s10 + $0x70] sm:$0xff]  }
  0x74   : > { %v549_v57 = vor.u32 %v547_v43, %v4113_v51  ;;  %v607_v58 = vshll.u32 %v4099_v41, 16  ;;  %v611_v59 = vshrl.u32 %v4099_v41, 16  ;;  %v615_v60 = vshll.u32 %v4105_v45, 16  ;;  %v4173_v33 = vld [vmem:[%s4008_s10 + $0x30] sm:$0xff]   ;;  %s3416_s23 = smul.u32 34, %s3757_s28  ;;  %s2704_s16 = sshll.u32 %s4012_s14, 4  ;;  %s5184_s16 = int_to_ptr.vmem [resolvable:$true] %s2704_s16 }
  0x75   : > { %v898_v53 = vsel %vm704_vm0, %v897_v47, %v4094_v38  ;;  %v868_v54 = vrot.slane %v866_v49, 1  ;;  %v619_v62 = vshrl.u32 %v4105_v45, 16  ;;  %v623_v3 = vshll.u32 %v4110_v50, 16  ;;  %s3417_s30 = smul.u32 68, %s3753_s27  ;;  %s2688_s20 = sshll.u32 %s4010_s25, 4  ;;  %s5192_s20 = int_to_ptr.vmem [resolvable:$true] %s2688_s20 }
  0x76   : > { %903 = vrot.lane.b32.xlu0 %v898_v53, %s3774_s4  ;;  %v554_v0 = vsel %vm526_vm1, %v549_v57, %v553_v52  ;;  %v4129_v1 = vrot.slane %v607_v58, 1  ;;  %v617_v2 = vrot.slane %v615_v60, 1  ;;  %v727_v5 = vsel %vm704_vm0, %v724_v55, %v726_v56  ;;  %v4185_v53 = vld [vmem:[%s4008_s10 + $0x78] sm:$0xff]   ;;  %s3418_s17 = smul.u32 4352, %s3757_s28  ;;  %p5329_p11 = scmp.ne.s32.totalorder %s5319_s11, 0 }
  0x77   : > { %v869_v61 = vor.u32 %v868_v54, %v864_v48  ;;  %671 = vrot.lane.b32.xlu1 %v554_v0, %s3775_s15  ;;  %v728_v7 = vrot.slane %v4110_v50, 1  ;;  %v625_v9 = vrot.slane %v623_v3, 1  ;;  %v555_v10 = vshrl.u32 %v4087_v35, 16  ;;  %s2685_s27 = sadd.s32 %s3417_s30, %s3416_s23  ;;  %s2673_s23 = scalar_lea.sflag [#allocation7], %s3988_s18 }
  0x78   : > { %v613_v6 = vor.u32 %v611_v59, %v4129_v1  ;;  %v621_v8 = vor.u32 %v619_v62, %v617_v2  ;;  %v559_v11 = vshll.u32 %v4126_v63, 16  ;;  %v712_v15 = vrot.slane %v4126_v63, 1  ;;  %v4195_v62 = vld [vmem:[%s4008_s10 + $0x38] sm:$0xff]   ;;  %s2994_s12 = sshll.u32 %s2685_s27, 6  ;;  %s3615_s30 = scalar_lea.vmem %s5184_s16, 4352 }
  0x79   : > { %v870_v4 = vsel %vm526_vm1, %v869_v61, %v4113_v51  ;;  %v729_v14 = vsel %vm704_vm0, %v726_v56, %v728_v7  ;;  %v627_v16 = vshrl.u32 %v4110_v50, 16  ;;  %v557_v18 = vor.u32 %v555_v10, %v553_v52  ;;  %s5190_s29 = scalar_lea.hbm %s5291_s5, %s2994_s12  ;;  %p3616_p10 = scmp.ne.s32.totalorder %s5184_s16, %s3615_s30 }
  0x7a   : > { %886 = vrot.lane.b32.xlu0 %v870_v4, %s3775_s15  ;;  %v618_v13 = vsel %vm526_vm1, %v613_v6, %v617_v2  ;;  %v626_v17 = vsel %vm526_vm1, %v621_v8, %v625_v9  ;;  %v561_v19 = vrot.slane %v559_v11, 1  ;;  %v631_v20 = vshll.u32 %v4144_v12, 16  ;;  %v4205_v8 = vld [vmem:[%s4008_s10 + $0x80] sm:$0xff]   ;;  %s3778_s27 = smov [#allocation6]  }
  0x7b   : > { %760 = vrot.lane.b32.xlu1 %v727_v5, %s3774_s4  ;;  %v713_v22 = vsel %vm704_vm0, %v710_v39, %v712_v15  ;;  %v730_v23 = vrot.slane %v4144_v12, 1  ;;  %v629_v24 = vor.u32 %v627_v16, %v625_v9  ;;  %v563_v27 = vshrl.u32 %v4126_v63, 16  ;;  %p3617_p8 = pnand %p3616_p10, %p5329_p11 }
  0x7c   : > { %v562_v25 = vsel %vm526_vm1, %v557_v18, %v561_v19  ;;  %v633_v26 = vrot.slane %v631_v20, 1  ;;  %v567_v28 = vshll.u32 %v4155_v21, 16  ;;  %v714_v31 = vrot.slane %v4155_v21, 1 }
  0x7d   : > { %v731_v30 = vsel %vm704_vm0, %v728_v7, %v730_v23  ;;  %v635_v32 = vshrl.u32 %v4144_v12, 16  ;;  %v565_v39 = vor.u32 %v563_v27, %v561_v19  ;;  %v639_v42 = vshll.u32 %v4165_v29, 16  ;;  %p3618_p3 = pneg %p3617_p8 }
  0x7e   : > { %687 = vrot.lane.b32.xlu0 %v618_v13, %s3775_s15  ;;  %v634_v37 = vsel %vm526_vm1, %v629_v24, %v633_v26  ;;  %v569_v40 = vrot.slane %v567_v28, 1  ;;  %v715_v43 = vsel %vm704_vm0, %v712_v15, %v714_v31  ;;  %v732_v44 = vrot.slane %v4165_v29, 1 }
  0x7f   : > { %762 = vrot.lane.b32.xlu1 %v729_v14, %s3774_s4  ;;  %v637_v46 = vor.u32 %v635_v32, %v633_v26  ;;  %v641_v48 = vrot.slane %v639_v42, 1  ;;  %v571_v49 = vshrl.u32 %v4155_v21, 16  ;;  %v575_v52 = vshll.u32 %v4173_v33, 16  ;;  %v4227_v26 = vld [vmem:[%s4008_s10 + $0x88] sm:$0xff]  }
  0x80   : > { %v570_v47 = vsel %vm526_vm1, %v565_v39, %v569_v40  ;;  %v733_v54 = vsel %vm704_vm0, %v730_v23, %v732_v44  ;;  %v716_v56 = vrot.slane %v4173_v33, 1  ;;  %v643_v57 = vshrl.u32 %v4165_v29, 16  ;;  %v3566_v42 = vld [vmem:[%s5287_s1 + $0xc] sm:$0xff]  }
  0x81   : > { %v642_v58 = vsel %vm526_vm1, %v637_v46, %v641_v48  ;;  %v573_v59 = vor.u32 %v571_v49, %v569_v40  ;;  %v577_v60 = vrot.slane %v575_v52, 1  ;;  %v647_v61 = vshll.u32 %v4185_v53, 16 }
  0x82   : > { %689 = vrot.lane.b32.xlu0 %v626_v17, %s3775_s15  ;;  %v717_v0 = vsel %vm704_vm0, %v714_v31, %v716_v56  ;;  %v734_v2 = vrot.slane %v4185_v53, 1  ;;  %v645_v3 = vor.u32 %v643_v57, %v641_v48  ;;  %v579_v6 = vshrl.u32 %v4173_v33, 16  ;;  %v4215_v17 = vld [vmem:[%s4008_s10 + $0x40] sm:$0xff]   ;;  %v4236_v31 = vld [vmem:[%s4008_s10 + $0x48] sm:$0xff]  }
  0x83   : > { %746 = vrot.lane.b32.xlu1 %v713_v22, %s3774_s4  ;;  %v578_v4 = vsel %vm526_vm1, %v573_v59, %v577_v60  ;;  %v649_v5 = vrot.slane %v647_v61, 1  ;;  %v583_v7 = vshll.u32 %v4195_v62, 16  ;;  %v718_v10 = vrot.slane %v4195_v62, 1 }
  0x84   : > { %v735_v9 = vsel %vm704_vm0, %v732_v44, %v734_v2  ;;  %v651_v11 = vshrl.u32 %v4185_v53, 16  ;;  %v581_v14 = vor.u32 %v579_v6, %v577_v60  ;;  %v655_v16 = vshll.u32 %v4205_v8, 16  ;;  %v3568_v44 = vld [vmem:[%s5287_s1 + $0x14] ss:$0 sps:$4 sm:$0xff]   ;;  %v1502_v6 = vld [vmem:[%s4008_s10 + $0x10] sm:$0xe] }
  0x85   : > { %v650_v13 = vsel %vm526_vm1, %v645_v3, %v649_v5  ;;  %v585_v15 = vrot.slane %v583_v7, 1  ;;  %v4219_v18 = vrot.slane %v4205_v8, 1  ;;  %v719_v19 = vsel %vm704_vm0, %v716_v56, %v718_v10  ;;  %v4256_v56 = vld [vmem:[%s4008_s10 + $0x90] ss:$0 sps:$4 sm:$0x11]  }
  0x86   : > { %673 = vrot.lane.b32.xlu0 %v562_v25, %s3775_s15  ;;  %v653_v20 = vor.u32 %v651_v11, %v649_v5  ;;  %v657_v23 = vrot.slane %v655_v16, 1  ;;  %v587_v24 = vshrl.u32 %v4195_v62, 16  ;;  %v591_v25 = vshll.u32 %v4215_v17, 16  ;;  %v1503_v7 = vld [vmem:[%s4008_s10 + $0x14] sm:$0xf] }
  0x87   : > { %764 = vrot.lane.b32.xlu1 %v731_v30, %s3774_s4  ;;  %v586_v22 = vsel %vm526_vm1, %v581_v14, %v585_v15  ;;  %v737_v27 = vsel %vm704_vm0, %v734_v2, %v4219_v18  ;;  %v720_v28 = vrot.slane %v4215_v17, 1  ;;  %v659_v30 = vshrl.u32 %v4205_v8, 16 }
  0x88   : > { %v658_v32 = vsel %vm526_vm1, %v653_v20, %v657_v23  ;;  %v593_v39 = vrot.slane %v591_v25, 1  ;;  %v872_v40 = vshll.u32 %v4227_v26, 16  ;;  %v595_v48 = vshrl.u32 %v4215_v17, 16  ;;  %v402_v20 = vld [vmem:[%s4008_s10] sm:$0xf] }
  0x89   : > { %v721_v46 = vsel %vm704_vm0, %v718_v10, %v720_v28  ;;  %v5303_v57 = vmov 0.0   ;;  %vm1114_vm2 = vcmask 1043456   ;;  %v722_v61 = vrot.slane %v4236_v31, 1  ;;  %v4301_v25 = vld [vmem:[%s4008_s10 + $0x20] sm:$0xff]  }
  0x8a   : > { %691 = vrot.lane.b32.xlu0 %v634_v37, %s3775_s15  ;;  %v589_v37 = vor.u32 %v587_v24, %v585_v15  ;;  %v874_v52 = vrot.slane %v872_v40, 1  ;;  %3190 = vmatprep.subr.bf16.mxu0 %v5303_v57  ;;  %v1116_v59 = vsel %vm1114_vm2, %v3568_v44, 0  ;;  %vm3777_vm3 = vmmov 0  }
  0x8b   : > { %748 = vrot.lane.b32.xlu1 %v715_v43, %s3774_s4  ;;  %v899_v43 = vrot.slane %v4227_v26, 1  ;;  %3406 = vmatprep.subr.bf16.mxu1 %v5303_v57  ;;  %v597_v3 = vor.u32 %v595_v48, %v593_v39  ;;  %v880_v5 = vshll.u32 %v4256_v56, 16  ;;  %v603_v16 = vshrl.u32 %v4236_v31, 16 }
  0x8c   : > { %v594_v49 = vsel %vm526_vm1, %v589_v37, %v593_v39  ;;  %3191 = vmatpush3.bf16.msra.mxu0 %v3566_v42  ;;  %3408 = vmatpush3.bf16.msra.mxu1 %v3566_v42  ;;  %v725_v40 = vsel %vm704_vm0, %v722_v61, %v724_v55  ;;  %v1646_v44 = vshll.u32 %v4301_v25, 16  ;;  %v884_v55 = vshrl.u32 %v4256_v56, 16 }
  0x8d   : > { %3192 = vmatprep.subr.bf16.mxu0 %v5303_v57  ;;  %v900_v60 = vsel %vm704_vm0, %v4219_v18, %v899_v43  ;;  %3194 = vmatprep.mubr.msk.bf16.mxu0 %vm3777_vm3, %v5303_v57  ;;  %v882_v15 = vrot.slane %v880_v5, 1  ;;  %vm774_vm4 = vcmask 64512   ;;  %vm809_vm5 = vcmask 130048  }
  0x8e   : > { %675 = vrot.lane.b32.xlu0 %v570_v47, %s3775_s15  ;;  %v4250_v47 = vor.u32 %v659_v30, %v657_v23  ;;  %3407 = vmatprep.subr.bf16.mxu1 %v5303_v57  ;;  %v404_v23 = vld [vmem:[%s4008_s10 + $0x8] sm:$0xf]  ;;  %vm1062_vm6 = vcmask 195584  }
  0x8f   : > { %766 = vrot.lane.b32.xlu1 %v733_v54, %s3774_s4  ;;  %v599_v54 = vshll.u32 %v4236_v31, 16  ;;  %3230 = vmatprep.mubr.msk.bf16.mxu1 %vm3777_vm3, %v5303_v57  ;;  %v4309_v39 = vcombine.low %v404_v23, %v4090_v36  ;;  %v1815_v23 = vrot.slane %v4301_v25, 1 }
  0x90   : > { %v875_v2 = vsel %vm526_vm1, %v4250_v47, %v874_v52  ;;  %3193 = vmatpush3.bf16.msra.mxu0 %v1116_v59  ;;  %3409 = vmatpush3.bf16.msra.mxu1 %v1116_v59 }
  0x91   : > { %3334 = vmatprep.subr.bf16.mxu0 %v5303_v57  ;;  %3262 = vmatprep.subr.bf16.mxu1 %v5303_v57 }
  0x92   : > { %693 = vrot.lane.b32.xlu0 %v642_v58, %s3775_s15  ;;  %v4261_v58 = vld [vmem:[%s4008_s10 + $0x90] ss:$0 sps:$4 sm:$0x33]  }
  0x93   : > { %750 = vrot.lane.b32.xlu1 %v717_v0, %s3774_s4  ;;  %v876_v0 = vshrl.u32 %v4227_v26, 16  ;;  %v901_v10 = vrot.slane %v4261_v58, 1  ;;  %v1648_v58 = vrot.slane %v1646_v44, 1 }
  0x95   : > { %v878_v11 = vor.u32 %v876_v0, %v874_v52  ;;  %v902_v24 = vsel %vm704_vm0, %v899_v43, %v901_v10  ;;  %v535_v0 = vshll.u32 %v4309_v39, 16 }
  0x96   : > { %677 = vrot.lane.b32.xlu0 %v578_v4, %s3775_s15  ;;  %v601_v4 = vrot.slane %v599_v54, 1 }
  0x97   : > { %768 = vrot.lane.b32.xlu1 %v735_v9, %s3774_s4  ;;  %v723_v9 = vsel %vm704_vm0, %v720_v28, %v722_v61  ;;  %v883_v28 = vsel %vm526_vm1, %v878_v11, %v882_v15  ;;  %v537_v11 = vrot.slane %v535_v0, 1 }
  0x98   : > { %v602_v14 = vsel %vm526_vm1, %v597_v3, %v601_v4  ;;  %v605_v30 = vor.u32 %v603_v16, %v601_v4  ;;  %v706_v16 = vrot.slane %v4309_v39, 1 }
  0x9a   : > { %695 = vrot.lane.b32.xlu0 %v650_v13, %s3775_s15  ;;  %v4287_v13 = vld [vmem:[%s4008_s10 + $0x18] sm:$0xff]  }
  0x9b   : > { %752 = vrot.lane.b32.xlu1 %v719_v19, %s3774_s4  ;;  %v4292_v19 = vcombine.low %v1502_v6, %v1503_v7  ;;  %v1642_v43 = vshrl.u32 %v4287_v13, 16  ;;  %v1813_v5 = vrot.slane %v4287_v13, 1 }
  0x9d   : > { %v1631_v36 = vshrl.u32 %v4292_v19, 16 }
  0x9e   : > { %679 = vrot.lane.b32.xlu0 %v586_v22, %s3775_s15  ;;  %v403_v22 = vld [vmem:[%s4008_s10 + $0x4] sm:$0xf] }
  0x9f   : > { %770 = vrot.lane.b32.xlu1 %v737_v27, %s3774_s4  ;;  %v1638_v27 = vshll.u32 %v4287_v13, 16  ;;  %v4306_v37 = vcombine.low %v402_v20, %v403_v22  ;;  %v539_v20 = vshrl.u32 %v4309_v39, 16 }
  0xa1   : > { %v1640_v42 = vrot.slane %v1638_v27, 1  ;;  %v530_v52 = vshll.u32 %v4306_v37, 16  ;;  %v528_v61 = vshrl.u32 %v4306_v37, 16 }
  0xa2   : > { %697 = vrot.lane.b32.xlu0 %v658_v32, %s3775_s15  ;;  %v1633_v32 = vshll.u32 %v4292_v19, 16 }
  0xa3   : > { %754 = vrot.lane.b32.xlu1 %v721_v46, %s3774_s4  ;;  %v610_v46 = vsel %vm526_vm1, %v605_v30, %v4129_v1  ;;  %v1644_v54 = vor.u32 %v1642_v43, %v1640_v42  ;;  %v532_v1 = vrot.slane %v530_v52, 1  ;;  %v541_v30 = vor.u32 %v539_v20, %v537_v11  ;;  %v4351_v43 = vld [vmem:[%s4008_s10 + $0x30] sm:$0xff]   ;;  %v4362_v52 = vld [vmem:[%s4008_s10 + $0x38] sm:$0xff]  }
  0xa4   : > { %v1635_v48 = vrot.slane %v1633_v32, 1  ;;  %v1816_v32 = vsel %vm704_vm0, %v1813_v5, %v1815_v23 }
  0xa5   : > { %v1649_v3 = vsel %vm526_vm1, %v1644_v54, %v1648_v58  ;;  %v546_v44 = vsel %vm526_vm1, %v541_v30, %v4113_v51  ;;  %v709_v51 = vsel %vm704_vm0, %v706_v16, %v4094_v38  ;;  %v1819_v54 = vrot.slane %v4351_v43, 1 }
  0xa6   : > { %681 = vrot.lane.b32.xlu0 %v594_v49, %s3775_s15  ;;  %v1538_v49 = vld [vmem:[%s4008_s10 + $0x10] sm:$0xc]  ;;  %v1674_v38 = vshrl.u32 %v4362_v52, 16 }
  0xa7   : > { %905 = vrot.lane.b32.xlu1 %v900_v60, %s3774_s4  ;;  %v2935_v59 = vcombine.low %v1538_v49, %v1503_v7  ;;  %v1636_v60 = vor.u32 %v1635_v48, %v1631_v36  ;;  %v533_v7 = vor.u32 %v532_v1, %v528_v61  ;;  %v1662_v49 = vshll.u32 %v4351_v43, 16  ;;  %v4373_v1 = vld [vmem:[%s4008_s10 + $0x40] sm:$0xff]  }
  0xa8   : > { %v1670_v61 = vshll.u32 %v4362_v52, 16 }
  0xa9   : > { %v1812_v4 = vrot.slane %v2935_v59, 1  ;;  %v1664_v59 = vrot.slane %v1662_v49, 1 }
  0xaa   : > { %888 = vrot.lane.b32.xlu0 %v875_v2, %s3775_s15  ;;  %v437_v2 = vld [vmem:[%s4008_s10] sm:$0xe] }
  0xab   : > { %756 = vrot.lane.b32.xlu1 %v723_v9, %s3774_s4  ;;  %v2870_v6 = vcombine.low %v437_v2, %v403_v22  ;;  %v1641_v9 = vsel %vm526_vm1, %v1636_v60, %v1640_v42  ;;  %v538_v22 = vsel %vm526_vm1, %v533_v7, %v537_v11  ;;  %v1666_v60 = vshrl.u32 %v4351_v43, 16 }
  0xac   : > { %v1821_v2 = vrot.slane %v4362_v52, 1  ;;  %v1823_v11 = vrot.slane %v4373_v1, 1 }
  0xad   : > { %v705_v15 = vrot.slane %v2870_v6, 1  ;;  %v1672_v6 = vrot.slane %v1670_v61, 1 }
  0xae   : > { %683 = vrot.lane.b32.xlu0 %v602_v14, %s3775_s15  ;;  %v4335_v14 = vld [vmem:[%s4008_s10 + $0x28] sm:$0xff]   ;;  %v1822_v7 = vsel %vm704_vm0, %v1819_v54, %v1821_v2 }
  0xaf   : > { %907 = vrot.lane.b32.xlu1 %v902_v24, %s3774_s4  ;;  %v1650_v24 = vshrl.u32 %v4301_v25, 16  ;;  %v1654_v27 = vshll.u32 %v4335_v14, 16  ;;  %v1658_v48 = vshrl.u32 %v4335_v14, 16  ;;  %v1676_v20 = vor.u32 %v1674_v38, %v1672_v6 }
  0xb1   : > { %v1656_v42 = vrot.slane %v1654_v27, 1 }
  0xb2   : > { %890 = vrot.lane.b32.xlu0 %v883_v28, %s3775_s15  ;;  %v707_v28 = vsel %vm704_vm0, %v705_v15, %v706_v16 }
  0xb3   : > { %758 = vrot.lane.b32.xlu1 %v725_v40, %s3774_s4  ;;  %v1652_v40 = vor.u32 %v1650_v24, %v1648_v58  ;;  %v1660_v58 = vor.u32 %v1658_v48, %v1656_v42  ;;  %v1824_v24 = vsel %vm704_vm0, %v1821_v2, %v1823_v11 }
  0xb5   : > { %v1657_v36 = vsel %vm526_vm1, %v1652_v40, %v1656_v42 }
  0xb6   : > { %685 = vrot.lane.b32.xlu0 %v610_v46, %s3775_s15  ;;  %v1817_v46 = vrot.slane %v4335_v14, 1 }
  0xb7   : > { %909 = vrot.lane.b32.xlu1 %v901_v10, %s3774_s4  ;;  %v1814_v10 = vsel %vm704_vm0, %v1812_v4, %v1813_v5  ;;  %v1665_v4 = vsel %vm526_vm1, %v1660_v58, %v1664_v59  ;;  %v1668_v5 = vor.u32 %v1666_v60, %v1664_v59  ;;  %v4413_v58 = vld [vmem:[%s4008_s10 + $0x60] sm:$0xff]  }
  0xb8   : > { %v1820_v0 = vsel %vm704_vm0, %v1817_v46, %v1819_v54 }
  0xb9   : > { %v1673_v16 = vsel %vm526_vm1, %v1668_v5, %v1672_v6  ;;  %v4423_v5 = vld [vmem:[%s4008_s10 + $0x68] sm:$0xff]  }
  0xba   : > { %892 = vrot.lane.b32.xlu0 %v884_v55, %s3775_s15  ;;  %v1818_v55 = vsel %vm704_vm0, %v1815_v23, %v1817_v46  ;;  %v4393_v23 = vld [vmem:[%s4008_s10 + $0x50] sm:$0xff]  }
  0xbb   : > { %1775 = vrot.lane.b32.xlu1 %v1649_v3, %s3775_s15  ;;  %v4381_v3 = vld [vmem:[%s4008_s10 + $0x48] sm:$0xff]   ;;  %v1694_v42 = vshll.u32 %v4393_v23, 16  ;;  %v1827_v48 = vrot.slane %v4393_v23, 1 }
  0xbc   : > { %v1686_v15 = vshll.u32 %v4381_v3, 16  ;;  %v1825_v30 = vrot.slane %v4381_v3, 1  ;;  %v1690_v40 = vshrl.u32 %v4381_v3, 16 }
  0xbe   : > { %1773 = vrot.lane.b32.xlu0 %v1641_v9, %s3775_s15  ;;  %v1678_v9 = vshll.u32 %v4373_v1, 16  ;;  %v1828_v59 = vsel %vm704_vm0, %v1825_v30, %v1827_v48 }
  0xbf   : > { %1847 = vrot.lane.b32.xlu1 %v1814_v10, %s3774_s4  ;;  %v1682_v10 = vshrl.u32 %v4373_v1, 16 }
  0xc2   : > { %667 = vrot.lane.b32.xlu0 %v538_v22, %s3775_s15  ;;  %v1680_v22 = vrot.slane %v1678_v9, 1  ;;  %v1831_v9 = vrot.slane %v4413_v58, 1 }
  0xc3   : > { %740 = vrot.lane.b32.xlu1 %v707_v28, %s3774_s4  ;;  %v1688_v28 = vrot.slane %v1686_v15, 1 }
  0xc4   : > { %v1684_v27 = vor.u32 %v1682_v10, %v1680_v22 }
  0xc5   : > { %v1692_v49 = vor.u32 %v1690_v40, %v1688_v28 }
  0xc6   : > { %1849 = vrot.lane.b32.xlu0 %v1816_v32, %s3774_s4  ;;  %v1681_v32 = vsel %vm526_vm1, %v1676_v20, %v1680_v22  ;;  %v1689_v46 = vsel %vm526_vm1, %v1684_v27, %v1688_v28  ;;  %v4433_v20 = vld [vmem:[%s4008_s10 + $0x70] sm:$0xff]   ;;  %v1833_v27 = vrot.slane %v4423_v5, 1  ;;  %v1722_v28 = vshrl.u32 %v4423_v5, 16 }
  0xc7   : > { %669 = vrot.lane.b32.xlu1 %v546_v44, %s3775_s15  ;;  %v4403_v44 = vld [vmem:[%s4008_s10 + $0x58] sm:$0xff]  }
  0xc8   : > { %v1702_v54 = vshll.u32 %v4403_v44, 16  ;;  %v1829_v60 = vrot.slane %v4403_v44, 1  ;;  %v1706_v61 = vshrl.u32 %v4403_v44, 16 }
  0xca   : > { %1777 = vrot.lane.b32.xlu0 %v1657_v36, %s3775_s15  ;;  %v1826_v36 = vsel %vm704_vm0, %v1823_v11, %v1825_v30  ;;  %v1704_v38 = vrot.slane %v1702_v54, 1  ;;  %v1830_v6 = vsel %vm704_vm0, %v1827_v48, %v1829_v60  ;;  %v4441_v30 = vld [vmem:[%s4008_s10 + $0x78] sm:$0xff]   ;;  %v1835_v48 = vrot.slane %v4433_v20, 1 }
  0xcb   : > { %742 = vrot.lane.b32.xlu1 %v709_v51, %s3774_s4  ;;  %v1698_v51 = vshrl.u32 %v4393_v23, 16 }
  0xcc   : > { %v1708_v10 = vor.u32 %v1706_v61, %v1704_v38 }
  0xce   : > { %1851 = vrot.lane.b32.xlu0 %v1818_v55, %s3774_s4  ;;  %v1696_v55 = vrot.slane %v1694_v42, 1 }
  0xcf   : > { %1853 = vrot.lane.b32.xlu1 %v1820_v0, %s3774_s4 }
  0xd0   : > { %v1697_v0 = vsel %vm526_vm1, %v1692_v49, %v1696_v55  ;;  %v1700_v2 = vor.u32 %v1698_v51, %v1696_v55  ;;  %v1834_v49 = vsel %vm704_vm0, %v1831_v9, %v1833_v27  ;;  %v1730_v55 = vshrl.u32 %v4433_v20, 16 }
  0xd1   : > { %v1734_v51 = vshll.u32 %v4441_v30, 16 }
  0xd2   : > { %1779 = vrot.lane.b32.xlu0 %v1665_v4, %s3775_s15  ;;  %v1710_v4 = vshll.u32 %v4413_v58, 16  ;;  %v1705_v11 = vsel %vm526_vm1, %v1700_v2, %v1704_v38 }
  0xd3   : > { %1855 = vrot.lane.b32.xlu1 %v1822_v7, %s3774_s4  ;;  %v1714_v7 = vshrl.u32 %v4413_v58, 16 }
  0xd4   : > { %v1712_v15 = vrot.slane %v1710_v4, 1  ;;  %v1837_v4 = vrot.slane %v4441_v30, 1 }
  0xd6   : > { %1781 = vrot.lane.b32.xlu0 %v1673_v16, %s3775_s15  ;;  %v1718_v16 = vshll.u32 %v4423_v5, 16  ;;  %v1716_v40 = vor.u32 %v1714_v7, %v1712_v15  ;;  %v1836_v7 = vsel %vm704_vm0, %v1833_v27, %v1835_v48 }
  0xd7   : > { %1857 = vrot.lane.b32.xlu1 %v1824_v24, %s3774_s4  ;;  %v1832_v24 = vsel %vm704_vm0, %v1829_v60, %v1831_v9 }
  0xd8   : > { %v1720_v42 = vrot.slane %v1718_v16, 1  ;;  %v4469_v16 = vld [vmem:[%s4008_s10 + $0x88] sm:$0xff]  }
  0xd9   : > { %5326 = vst [vmem:[#allocation21_spill] sm:$0xff] %v4469_v16 }
  0xda   : > { %1783 = vrot.lane.b32.xlu0 %v1681_v32, %s3775_s15  ;;  %v1713_v32 = vsel %vm526_vm1, %v1708_v10, %v1712_v15  ;;  %v1724_v60 = vor.u32 %v1722_v28, %v1720_v42  ;;  %v1736_v15 = vrot.slane %v1734_v51, 1 }
  0xdb   : > { %1859 = vrot.lane.b32.xlu1 %v1826_v36, %s3774_s4 }
  0xde   : > { %1785 = vrot.lane.b32.xlu0 %v1689_v46, %s3775_s15  ;;  %v1726_v46 = vshll.u32 %v4433_v20, 16 }
  0xdf   : > { %1861 = vrot.lane.b32.xlu1 %v1828_v59, %s3774_s4  ;;  %v1721_v59 = vsel %vm526_vm1, %v1716_v40, %v1720_v42  ;;  %v1838_v42 = vsel %vm704_vm0, %v1835_v48, %v1837_v4 }
  0xe0   : > { %v1728_v61 = vrot.slane %v1726_v46, 1 }
  0xe2   : > { %1787 = vrot.lane.b32.xlu0 %v1697_v0, %s3775_s15  ;;  %v4453_v0 = vld [vmem:[%s4008_s10 + $0x80] sm:$0xff]   ;;  %v1732_v10 = vor.u32 %v1730_v55, %v1728_v61 }
  0xe3   : > { %1863 = vrot.lane.b32.xlu1 %v1830_v6, %s3774_s4  ;;  %v1742_v40 = vshll.u32 %v4453_v0, 16  ;;  %v1839_v46 = vrot.slane %v4453_v0, 1  ;;  %v1746_v51 = vshrl.u32 %v4453_v0, 16 }
  0xe4   : > { %v1737_v48 = vsel %vm526_vm1, %v1732_v10, %v1736_v15 }
  0xe5   : > { %v745_v22 = vpop.permute.xlu1 %744 }
  0xe6   : > { %1789 = vrot.lane.b32.xlu0 %v1705_v11, %s3775_s15 }
  0xe7   : > { %1865 = vrot.lane.b32.xlu1 %v1832_v24, %s3774_s4 }
  0xe8   : > { %v904_v36 = vpop.permute.xlu0 %903 }
  0xe9   : > { %v672_v54 = vpop.permute.xlu1 %671 }
  0xea   : > { %1791 = vrot.lane.b32.xlu0 %v1713_v32, %s3775_s15  ;;  %v780_v2 = vsel %vm774_vm4, %v4084_v34, %v672_v54  ;;  %v1738_v34 = vshrl.u32 %v4441_v30, 16  ;;  %v1729_v32 = vsel %vm526_vm1, %v1724_v60, %v1728_v61  ;;  %v4481_v54 = vld [vmem:[%s4008_s10 + $0x90] sm:$0xff]   ;;  %v1750_v61 = vshll.u32 %v4469_v16, 16 }
  0xeb   : > { %v4459_v6 = vsel %vm809_vm5, %v780_v2, %v745_v22  ;;  %1867 = vrot.lane.b32.xlu1 %v1834_v49, %s3774_s4 }
  0xec   : > { %v887_v38 = vpop.permute.xlu0 %886  ;;  %v937_v22 = vshll.u32 %v4459_v6, 16  ;;  %v1740_v60 = vor.u32 %v1738_v34, %v1736_v15 }
  0xed   : > { %v912_v9 = vsel %vm774_vm4, %v4309_v39, %v887_v38  ;;  %v761_v28 = vpop.permute.xlu1 %760 }
  0xee   : > { %v920_v11 = vsel %vm809_vm5, %v912_v9, %v904_v36  ;;  %1793 = vrot.lane.b32.xlu0 %v1721_v59, %s3775_s15  ;;  %v939_v2 = vrot.slane %v937_v22, 1  ;;  %v1758_v22 = vshll.u32 %v4481_v54, 16 }
  0xef   : > { %v933_v24 = vshll.u32 %v920_v11, 16  ;;  %v931_v36 = vshrl.u32 %v920_v11, 16  ;;  %1869 = vrot.lane.b32.xlu1 %v1836_v7, %s3774_s4  ;;  %v3569_v7 = vld [vmem:[%s5287_s1 + $0x18] sm:$0xff]   ;;  %v1744_v11 = vrot.slane %v1742_v40, 1  ;;  %v1840_v40 = vsel %vm704_vm0, %v1837_v4, %v1839_v46 }
  0xf0   : > { %v688_v27 = vpop.permute.xlu0 %687 }
  0xf1   : > { %v935_v49 = vrot.slane %v933_v24, 1  ;;  %v796_v55 = vsel %vm774_vm4, %v4099_v41, %v688_v27  ;;  %v763_v9 = vpop.permute.xlu1 %762  ;;  %v1752_v27 = vrot.slane %v1750_v61, 1  ;;  %v1841_v61 = vrot.slane %v4469_v16, 1 }
  0xf2   : > { %v4484_v59 = vsel %vm809_vm5, %v796_v55, %v761_v28  ;;  %1795 = vrot.lane.b32.xlu0 %v1729_v32, %s3775_s15  ;;  %v3576_v28 = vld [vmem:[%s5287_s1 + $0x20] ss:$0 sps:$4 sm:$0xff]  }
  0xf3   : > { %v936_v38 = vor.u32 %v935_v49, %v931_v36  ;;  %v993_v41 = vshll.u32 %v4484_v59, 16  ;;  %1871 = vrot.lane.b32.xlu1 %v1838_v42, %s3774_s4  ;;  %v4513_v36 = vld [vmem:[%s4008_s10 + $0x98] ss:$0 sps:$4 sm:$0x33]   ;;  %v997_v42 = vshrl.u32 %v4484_v59, 16  ;;  %v2074_v4 = vsel %vm1114_vm2, %v3576_v28, 0 }
  0xf4   : > { %v690_v24 = vpop.permute.xlu0 %689  ;;  %v1762_v28 = vshrl.u32 %v4481_v54, 16 }
  0xf5   : > { %v4496_v10 = vrot.slane %v993_v41, 1  ;;  %v798_v15 = vsel %vm774_vm4, %v4105_v45, %v690_v24  ;;  %v940_v34 = vsel %vm526_vm1, %v936_v38, %v939_v2  ;;  %v1754_v45 = vshrl.u32 %v4469_v16, 16  ;;  %v747_v55 = vpop.permute.xlu1 %746 }
  0xf6   : > { %v4504_v32 = vsel %vm809_vm5, %v798_v15, %v763_v9  ;;  %3195 = vmatmul.mubr.msk.bf16.vlgmr.msra.gmra.mrb[0].mxu0 %vm1062_vm6, %v940_v34  ;;  %1797 = vrot.lane.b32.xlu0 %v1737_v48, %s3775_s15  ;;  %v1745_v48 = vsel %vm526_vm1, %v1740_v60, %v1744_v11  ;;  %v1748_v38 = vor.u32 %v1746_v51, %v1744_v11  ;;  %v1760_v51 = vrot.slane %v1758_v22, 1  ;;  %v3577_v11 = vld [vmem:[%s5287_s1 + $0x8] ss:$0 sps:$4 sm:$0xff]  }
  0xf7   : > { %v1000_v49 = vshll.u32 %v4504_v32, 16  ;;  %3335 = vmatpush3.bf16.msra.mxu0 %v3569_v7  ;;  %3198 = vmatprep.mubr.msk.bf16.mxu0 %vm3777_vm3, %v5303_v57  ;;  %v999_v15 = vor.u32 %v997_v42, %v4496_v10  ;;  %v3571_v7 = vld [vmem:[%s5287_s1] sm:$0xff]   ;;  %v1766_v34 = vshll.u32 %v4513_v36, 16  ;;  %v941_v42 = vshrl.u32 %v4459_v6, 16 }
  0xf8   : > { %v674_v41 = vpop.permute.xlu0 %673  ;;  %3336 = vmatprep.subr.bf16.mxu0 %v5303_v57  ;;  %1873 = vrot.lane.b32.xlu1 %v1840_v40, %s3774_s4 }
  0xf9   : > { %v1002_v9 = vrot.slane %v1000_v49, 1  ;;  %v782_v24 = vsel %vm774_vm4, %v4087_v35, %v674_v41  ;;  %v1756_v35 = vor.u32 %v1754_v45, %v1752_v27  ;;  %v765_v22 = vpop.permute.xlu1 %764  ;;  %v1842_v45 = vsel %vm704_vm0, %v1839_v46, %v1841_v61 }
  0xfa   : > { %v4531_v60 = vsel %vm809_vm5, %v782_v24, %v747_v55  ;;  %1799 = vrot.lane.b32.xlu0 %v1745_v48, %s3775_s15  ;;  %v1753_v55 = vsel %vm526_vm1, %v1748_v38, %v1752_v27  ;;  %v1843_v48 = vrot.slane %v4481_v54, 1  ;;  %v4549_v24 = vld [vmem:[%s4008_s10 + $0x88] ss:$0 sps:$4 sm:$0x11]   ;;  %v1331_v46 = vsel %vm1114_vm2, %v3577_v11, 0 }
  0xfb   : > { %v944_v40 = vshll.u32 %v4531_v60, 16  ;;  %v1003_v49 = vsel %vm526_vm1, %v999_v15, %v1002_v9  ;;  %3337 = vmatpush3.bf16.msra.mxu0 %v2074_v4  ;;  %v943_v15 = vor.u32 %v941_v42, %v939_v2  ;;  %v5327_v4 = vmov 0.0  }
  0xfc   : > { %3231 = vmatmul.mubr.msk.bf16.vlgmr.msra.gmra.mrb[0].mxu1 %vm1062_vm6, %v1003_v49  ;;  %v692_v41 = vpop.permute.xlu0 %691  ;;  %v1761_v38 = vsel %vm526_vm1, %v1756_v35, %v1760_v51  ;;  %v1004_v49 = vshrl.u32 %v4504_v32, 16  ;;  %1875 = vrot.lane.b32.xlu1 %v1842_v45, %s3774_s4  ;;  %v1844_v11 = vsel %vm704_vm0, %v1841_v61, %v1843_v48  ;;  %v663_v35 = vshll.u32 %v4549_v24, 16 }
  0xfd   : > { %v946_v57 = vrot.slane %v944_v40, 1  ;;  %v800_v16 = vsel %vm774_vm4, %v4110_v50, %v692_v41  ;;  %3263 = vmatpush3.bf16.msra.mxu1 %v3571_v7  ;;  %3234 = vmatprep.mubr.msk.bf16.mxu1 %vm3777_vm3, %v5327_v4  ;;  %v1764_v40 = vor.u32 %v1762_v28, %v1760_v51  ;;  %v749_v2 = vpop.permute.xlu1 %748  ;;  %v1770_v61 = vshrl.u32 %v4513_v36, 16 }
  0xfe   : > { %v4556_v27 = vsel %vm809_vm5, %v800_v16, %v765_v22  ;;  %3264 = vmatprep.subr.bf16.mxu1 %v5327_v4  ;;  %1801 = vrot.lane.b32.xlu0 %v1753_v55, %s3775_s15  ;;  %v1768_v16 = vrot.slane %v1766_v34, 1  ;;  %v1845_v22 = vrot.slane %v4513_v36, 1  ;;  %v1006_v55 = vor.u32 %v1004_v49, %v1002_v9 }
  0xff   : > { %v1007_v50 = vshll.u32 %v4556_v27, 16  ;;  %v947_v7 = vsel %vm526_vm1, %v943_v15, %v946_v57  ;;  %v948_v41 = vshrl.u32 %v4531_v60, 16  ;;  %v665_v49 = vrot.slane %v663_v35, 1 }
 0x100   : > { %v676_v42 = vpop.permute.xlu0 %675  ;;  %3199 = vmatmul.mubr.msk.bf16.gmra.mrb[4].mxu0 %vm1062_vm6, %v947_v7  ;;  %1877 = vrot.lane.b32.xlu1 %v1844_v11, %s3774_s4 }
 0x101   : > { %v1009_v51 = vrot.slane %v1007_v50, 1  ;;  %v784_v28 = vsel %vm774_vm4, %v4126_v63, %v676_v42  ;;  %3202 = vmatprep.mubr.msk.bf16.mxu0 %vm3777_vm3, %v5327_v4  ;;  %3265 = vmatpush3.bf16.msra.mxu1 %v1331_v46  ;;  %v767_v15 = vpop.permute.xlu1 %766  ;;  %v1769_v63 = vsel %vm526_vm1, %v1764_v40, %v1768_v16  ;;  %v1846_v46 = vsel %vm704_vm0, %v1843_v48, %v1845_v22 }
 0x102   : > { %v4575_v34 = vsel %vm809_vm5, %v784_v28, %v749_v2  ;;  %1803 = vrot.lane.b32.xlu0 %v1761_v38, %s3775_s15  ;;  %v950_v2 = vor.u32 %v948_v41, %v946_v57  ;;  %v1772_v40 = vor.u32 %v1770_v61, %v1768_v16  ;;  %v1011_v42 = vshrl.u32 %v4556_v27, 16 }
 0x103   : > { %v951_v45 = vshll.u32 %v4575_v34, 16  ;;  %v1010_v50 = vsel %vm526_vm1, %v1006_v55, %v1009_v51  ;;  %v666_v57 = vsel %vm526_vm1, %v4250_v47, %v665_v49  ;;  %v738_v28 = vrot.slane %v4549_v24, 1 }
 0x104   : > { %3235 = vmatmul.mubr.msk.bf16.gmra.mrb[4].mxu1 %vm1062_vm6, %v1010_v50  ;;  %v694_v9 = vpop.permute.xlu0 %693  ;;  %1879 = vrot.lane.b32.xlu1 %v1846_v46, %s3774_s4  ;;  %v1013_v61 = vor.u32 %v1011_v42, %v1009_v51 }
 0x105   : > { %v953_v38 = vrot.slane %v951_v45, 1  ;;  %v802_v36 = vsel %vm774_vm4, %v4144_v12, %v694_v9  ;;  %3238 = vmatprep.mubr.msk.bf16.mxu1 %vm3777_vm3, %v5327_v4  ;;  %v751_v48 = vpop.permute.xlu1 %750  ;;  %v955_v45 = vshrl.u32 %v4575_v34, 16  ;;  %v739_v51 = vsel %vm704_vm0, %v4219_v18, %v738_v28 }
 0x106   : > { %v4591_v7 = vsel %vm809_vm5, %v802_v36, %v767_v15  ;;  %1805 = vrot.lane.b32.xlu0 %v1769_v63, %s3775_s15 }
 0x107   : > { %v1014_v11 = vshll.u32 %v4591_v7, 16  ;;  %v954_v35 = vsel %vm526_vm1, %v950_v2, %v953_v38  ;;  %v957_v9 = vor.u32 %v955_v45, %v953_v38  ;;  %v1018_v49 = vshrl.u32 %v4591_v7, 16 }
 0x108   : > { %v678_v12 = vpop.permute.xlu0 %677  ;;  %3203 = vmatmul.mubr.msk.bf16.gmra.mrb[8].mxu0 %vm1062_vm6, %v954_v35  ;;  %699 = vrot.lane.b32.xlu1 %v666_v57, %s3775_s15 }
 0x109   : > { %v1016_v55 = vrot.slane %v1014_v11, 1  ;;  %v786_v16 = vsel %vm774_vm4, %v4155_v21, %v678_v12  ;;  %3206 = vmatprep.mubr.msk.bf16.mxu0 %vm3777_vm3, %v5327_v4  ;;  %v769_v47 = vpop.permute.xlu1 %768 }
 0x10a   : > { %v4607_v41 = vsel %vm809_vm5, %v786_v16, %v751_v48  ;;  %1807 = vrot.lane.b32.xlu0 %v1772_v40, %s3775_s15 }
 0x10b   : > { %v958_v15 = vshll.u32 %v4607_v41, 16  ;;  %v1017_v24 = vsel %vm526_vm1, %v1013_v61, %v1016_v55  ;;  %v1020_v42 = vor.u32 %v1018_v49, %v1016_v55  ;;  %v962_v11 = vshrl.u32 %v4607_v41, 16 }
 0x10c   : > { %3239 = vmatmul.mubr.msk.bf16.gmra.mrb[8].mxu1 %vm1062_vm6, %v1017_v24  ;;  %v696_v21 = vpop.permute.xlu0 %695  ;;  %772 = vrot.lane.b32.xlu1 %v739_v51, %s3774_s4 }
 0x10d   : > { %v960_v50 = vrot.slane %v958_v15, 1  ;;  %v804_v63 = vsel %vm774_vm4, %v4165_v29, %v696_v21  ;;  %3242 = vmatprep.mubr.msk.bf16.mxu1 %vm3777_vm3, %v5327_v4  ;;  %v753_v2 = vpop.permute.xlu1 %752 }
 0x10e   : > { %v4622_v46 = vsel %vm809_vm5, %v804_v63, %v769_v47  ;;  %1881 = vrot.lane.b32.xlu0 %v1845_v22, %s3774_s4  ;;  %s5180_s4 = scalar_lea.hbm %s5292_s6, %s3418_s17  ;;  %s3619_s17 = sshll.u32 %s3778_s27, 4  ;;  %s3620_s17 = int_to_ptr.vmem [resolvable:$false] %s3619_s17 }
 0x10f   : > { %v1021_v36 = vshll.u32 %v4622_v46, 16  ;;  %v961_v18 = vsel %vm526_vm1, %v957_v9, %v960_v50  ;;  %v964_v55 = vor.u32 %v962_v11, %v960_v50  ;;  %v1025_v61 = vshrl.u32 %v4622_v46, 16  ;;  %s3621_s9 = scalar_lea.vmem %s3620_s17, 8704  ;;  %p3622_p9 = scmp.lt.s32.totalorder %s5184_s16, %s3620_s17 }
 0x110   : > { %v680_v40 = vpop.permute.xlu0 %679  ;;  %3207 = vmatmul.mubr.msk.bf16.gmra.mrb[12].mxu0 %vm1062_vm6, %v961_v18  ;;  %p3623_p13 = scmp.lt.s32.totalorder %s3621_s9, %s3615_s30 }
 0x111   : > { %v1023_v29 = vrot.slane %v1021_v36, 1  ;;  %v788_v38 = vsel %vm774_vm4, %v4173_v33, %v680_v40  ;;  %3210 = vmatprep.mubr.msk.bf16.mxu0 %vm3777_vm3, %v5327_v4  ;;  %v771_v35 = vpop.permute.xlu1 %770 }
 0x112   : > { %v4635_v22 = vsel %vm809_vm5, %v788_v38, %v753_v2  ;;  %p3624_p0 = por %p3623_p13, %p3622_p9 }
 0x113   : > { %v965_v48 = vshll.u32 %v4635_v22, 16  ;;  %v1024_v12 = vsel %vm526_vm1, %v1020_v42, %v1023_v29  ;;  %v1027_v51 = vor.u32 %v1025_v61, %v1023_v29  ;;  %v969_v63 = vshrl.u32 %v4635_v22, 16 }
 0x114   : > { %3243 = vmatmul.mubr.msk.bf16.gmra.mrb[12].mxu1 %vm1062_vm6, %v1024_v12  ;;  %v698_v57 = vpop.permute.xlu0 %697  ;;  %p3625_p1 = pnand %p3624_p0, %p3618_p3 }
 0x115   : > { %v967_v28 = vrot.slane %v965_v48, 1  ;;  %v806_v33 = vsel %vm774_vm4, %v4185_v53, %v698_v57  ;;  %3246 = vmatprep.mubr.msk.bf16.mxu1 %vm3777_vm3, %v5327_v4  ;;  %v755_v15 = vpop.permute.xlu1 %754 }
 0x116   : > { %v4646_v16 = vsel %vm809_vm5, %v806_v33, %v771_v35 }
 0x117   : > { %v1028_v45 = vshll.u32 %v4646_v16, 16  ;;  %v968_v47 = vsel %vm526_vm1, %v964_v55, %v967_v28  ;;  %v971_v40 = vor.u32 %v969_v63, %v967_v28  ;;  %v1032_v38 = vshrl.u32 %v4646_v16, 16 }
 0x118   : > { %v682_v24 = vpop.permute.xlu0 %681  ;;  %3211 = vmatmul.mubr.msk.bf16.gmra.mrb[16].mxu0 %vm1062_vm6, %v968_v47 }
 0x119   : > { %v1030_v21 = vrot.slane %v1028_v45, 1  ;;  %v790_v53 = vsel %vm774_vm4, %v4195_v62, %v682_v24  ;;  %3214 = vmatprep.mubr.msk.bf16.mxu0 %vm3777_vm3, %v5327_v4  ;;  %v906_v49 = vpop.permute.xlu1 %905 }
 0x11a   : > { %v4657_v50 = vsel %vm809_vm5, %v790_v53, %v755_v15 }
 0x11b   : > { %v972_v9 = vshll.u32 %v4657_v50, 16  ;;  %v1031_v36 = vsel %vm526_vm1, %v1027_v51, %v1030_v21  ;;  %v976_v33 = vshrl.u32 %v4657_v50, 16 }
 0x11c   : > { %3247 = vmatmul.mubr.msk.bf16.gmra.mrb[16].mxu1 %vm1062_vm6, %v1031_v36  ;;  %v889_v2 = vpop.permute.xlu0 %888 }
 0x11d   : > { %v974_v18 = vrot.slane %v972_v9, 1  ;;  %v914_v62 = vsel %vm774_vm4, %v4205_v8, %v889_v2  ;;  %3250 = vmatprep.mubr.msk.bf16.mxu1 %vm3777_vm3, %v5327_v4  ;;  %v757_v11 = vpop.permute.xlu1 %756  ;;  %v1034_v8 = vor.u32 %v1032_v38, %v1030_v21 }
 0x11e   : > { %v922_v29 = vsel %vm809_vm5, %v914_v62, %v906_v49 }
 0x11f   : > { %v1035_v42 = vshll.u32 %v922_v29, 16  ;;  %v975_v48 = vsel %vm526_vm1, %v971_v40, %v974_v18  ;;  %v978_v24 = vor.u32 %v976_v33, %v974_v18  ;;  %v1039_v53 = vshrl.u32 %v922_v29, 16 }
 0x120   : > { %v684_v35 = vpop.permute.xlu0 %683  ;;  %3215 = vmatmul.mubr.msk.bf16.gmra.mrb[20].mxu0 %vm1062_vm6, %v975_v48 }
 0x121   : > { %v1037_v12 = vrot.slane %v1035_v42, 1  ;;  %v792_v57 = vsel %vm774_vm4, %v4215_v17, %v684_v35  ;;  %3218 = vmatprep.mubr.msk.bf16.mxu0 %vm3777_vm3, %v5327_v4  ;;  %v908_v61 = vpop.permute.xlu1 %907 }
 0x122   : > { %v4676_v28 = vsel %vm809_vm5, %v792_v57, %v757_v11 }
 0x123   : > { %v979_v55 = vshll.u32 %v4676_v28, 16  ;;  %v1038_v45 = vsel %vm526_vm1, %v1034_v8, %v1037_v12  ;;  %v1041_v36 = vor.u32 %v1039_v53, %v1037_v12  ;;  %v983_v18 = vshrl.u32 %v4676_v28, 16 }
 0x124   : > { %3251 = vmatmul.mubr.msk.bf16.gmra.mrb[20].mxu1 %vm1062_vm6, %v1038_v45  ;;  %v891_v15 = vpop.permute.xlu0 %890 }
 0x125   : > { %v981_v47 = vrot.slane %v979_v55, 1  ;;  %v916_v17 = vsel %vm774_vm4, %v4227_v26, %v891_v15  ;;  %3254 = vmatprep.mubr.msk.bf16.mxu1 %vm3777_vm3, %v5327_v4  ;;  %v759_v63 = vpop.permute.xlu1 %758 }
 0x126   : > { %v924_v21 = vsel %vm809_vm5, %v916_v17, %v908_v61 }
 0x127   : > { %v1042_v51 = vshll.u32 %v924_v21, 16  ;;  %v982_v9 = vsel %vm526_vm1, %v978_v24, %v981_v47  ;;  %v985_v48 = vor.u32 %v983_v18, %v981_v47  ;;  %v1046_v12 = vshrl.u32 %v924_v21, 16 }
 0x128   : > { %v686_v49 = vpop.permute.xlu0 %685  ;;  %3219 = vmatmul.mubr.msk.bf16.gmra.mrb[24].mxu0 %vm1062_vm6, %v982_v9 }
 0x129   : > { %v1044_v2 = vrot.slane %v1042_v51, 1  ;;  %v794_v62 = vsel %vm774_vm4, %v4236_v31, %v686_v49  ;;  %3222 = vmatprep.mubr.msk.bf16.mxu0 %vm3777_vm3, %v5327_v4  ;;  %v910_v29 = vpop.permute.xlu1 %909 }
 0x12a   : > { %v4694_v26 = vsel %vm809_vm5, %v794_v62, %v759_v63 }
 0x12b   : > { %v986_v40 = vshll.u32 %v4694_v26, 16  ;;  %v1045_v38 = vsel %vm526_vm1, %v1041_v36, %v1044_v2  ;;  %v1048_v61 = vor.u32 %v1046_v12, %v1044_v2  ;;  %v990_v45 = vshrl.u32 %v4694_v26, 16 }
 0x12c   : > { %3255 = vmatmul.mubr.msk.bf16.gmra.mrb[24].mxu1 %vm1062_vm6, %v1045_v38  ;;  %v893_v42 = vpop.permute.xlu0 %892 }
 0x12d   : > { %v988_v11 = vrot.slane %v986_v40, 1  ;;  %v918_v31 = vsel %vm774_vm4, %v4256_v56, %v893_v42  ;;  %3258 = vmatprep.mubr.msk.bf16.mxu1 %vm3777_vm3, %v5327_v4  ;;  %v1776_v8 = vpop.permute.xlu1 %1775 }
 0x12e   : > { %v926_v35 = vsel %vm809_vm5, %v918_v31, %v910_v29  ;;  %v1886_v63 = vsel %vm774_vm4, %v4287_v13, %v1776_v8 }
 0x12f   : > { %v1049_v57 = vshll.u32 %v926_v35, 16  ;;  %v989_v33 = vsel %vm526_vm1, %v985_v48, %v988_v11  ;;  %v992_v17 = vor.u32 %v990_v45, %v988_v11 }
 0x130   : > { %v1774_v55 = vpop.permute.xlu0 %1773  ;;  %3223 = vmatmul.mubr.msk.bf16.gmra.mrb[28].mxu0 %vm1062_vm6, %v989_v33 }
 0x131   : > { %v1051_v15 = vrot.slane %v1049_v57, 1  ;;  %3226 = vmatprep.mubr.msk.bf16.mxu0 %vm3777_vm3, %v5327_v4  ;;  %v1848_v56 = vpop.permute.xlu1 %1847  ;;  %v1884_v21 = vsel %vm774_vm4, %v4292_v19, %v1774_v55  ;;  %v996_v53 = vsel %vm526_vm1, %v992_v17, %v4496_v10 }
 0x132   : > { %v1921_v19 = vsel %vm809_vm5, %v1884_v21, %v1848_v56 }
 0x133   : > { %v1052_v47 = vsel %vm526_vm1, %v1048_v61, %v1051_v15  ;;  %v1978_v18 = vrot.slane %v1921_v19, 1 }
 0x134   : > { %3259 = vmatmul.mubr.msk.bf16.gmra.mrb[28].mxu1 %vm1062_vm6, %v1052_v47  ;;  %v668_v24 = vpop.permute.xlu0 %667 }
 0x135   : > { %3266 = vmatprep.mubr.msk.bf16.mxu1 %vm3777_vm3, %v5327_v4  ;;  %v741_v51 = vpop.permute.xlu1 %740  ;;  %v776_v9 = vsel %vm774_vm4, %v4306_v37, %v668_v24 }
 0x136   : > { %v811_v2 = vsel %vm809_vm5, %v776_v9, %v741_v51 }
 0x138   : > { %3227 = vmatmul.mubr.msk.bf16.gmra.mrb[32].mxu0 %vm1062_vm6, %v996_v53  ;;  %v1850_v49 = vpop.permute.xlu0 %1849 }
 0x139   : > { %v1923_v36 = vsel %vm809_vm5, %v1886_v63, %v1850_v49  ;;  %3338 = vmatprep.mubr.msk.bf16.mxu0 %vm3777_vm3, %v5327_v4  ;;  %v670_v62 = vpop.permute.xlu1 %669 }
 0x13a   : > { %v1979_v10 = vrot.slane %v1923_v36, 1  ;;  %v778_v40 = vsel %vm774_vm4, %v4309_v39, %v670_v62 }
 0x13c   : > { %3267 = vmatmul.mubr.msk.bf16.vlgmr.msra.gmra.mrb[32].mxu1 %vm1062_vm6, %v811_v2  ;;  %v1778_v13 = vpop.permute.xlu0 %1777  ;;  %v1980_v29 = vsel %vm704_vm0, %v1978_v18, %v1979_v10 }
 0x13d   : > { %3270 = vmatprep.mubr.msk.bf16.mxu1 %vm3777_vm3, %v5327_v4  ;;  %v1888_v37 = vsel %vm774_vm4, %v4301_v25, %v1778_v13  ;;  %v743_v38 = vpop.permute.xlu1 %742 }
 0x13e   : > { %v813_v31 = vsel %vm809_vm5, %v778_v40, %v743_v38 }
 0x140   : > { %3339 = vmatmul.mubr.msk.bf16.vlgmr.msra.gmra.mrb[36].mxu0 %vm1062_vm6, %v1980_v29  ;;  %v1852_v42 = vpop.permute.xlu0 %1851 }
 0x141   : > { %v1925_v11 = vsel %vm809_vm5, %v1888_v37, %v1852_v42  ;;  %3342 = vmatprep.mubr.msk.bf16.mxu0 %vm3777_vm3, %v5327_v4  ;;  %v1854_v35 = vpop.permute.xlu1 %1853 }
 0x142   : > { %v1981_v48 = vrot.slane %v1925_v11, 1 }
 0x144   : > { %3271 = vmatmul.mubr.msk.bf16.gmra.mrb[36].mxu1 %vm1062_vm6, %v813_v31  ;;  %v1780_v25 = vpop.permute.xlu0 %1779  ;;  %v1982_v12 = vsel %vm704_vm0, %v1979_v10, %v1981_v48 }
 0x145   : > { %v1890_v39 = vsel %vm774_vm4, %v4335_v14, %v1780_v25  ;;  %3274 = vmatprep.mubr.msk.bf16.mxu1 %vm3777_vm3, %v5327_v4  ;;  %v1856_v55 = vpop.permute.xlu1 %1855 }
 0x146   : > { %v1927_v57 = vsel %vm809_vm5, %v1890_v39, %v1854_v35 }
 0x147   : > { %v1983_v33 = vrot.slane %v1927_v57, 1 }
 0x148   : > { %3343 = vmatmul.mubr.msk.bf16.gmra.mrb[40].mxu0 %vm1062_vm6, %v1982_v12  ;;  %v1782_v8 = vpop.permute.xlu0 %1781 }
 0x149   : > { %3346 = vmatprep.mubr.msk.bf16.mxu0 %vm3777_vm3, %v5327_v4  ;;  %v1892_v14 = vsel %vm774_vm4, %v4351_v43, %v1782_v8  ;;  %v1984_v61 = vsel %vm704_vm0, %v1981_v48, %v1983_v33 }
 0x14a   : > { %v1929_v45 = vsel %vm809_vm5, %v1892_v14, %v1856_v55 }
 0x14b   : > { %v1985_v56 = vrot.slane %v1929_v45, 1 }
 0x14c   : > { %3275 = vmatmul.mubr.msk.bf16.gmra.mrb[40].mxu1 %vm1062_vm6, %v4459_v6  ;;  %v1784_v15 = vpop.permute.xlu0 %1783  ;;  %v1858_v6 = vpop.permute.xlu1 %1857 }
 0x14d   : > { %3278 = vmatprep.mubr.msk.bf16.mxu1 %vm3777_vm3, %v5327_v4  ;;  %v1894_v43 = vsel %vm774_vm4, %v4362_v52, %v1784_v15  ;;  %v1986_v47 = vsel %vm704_vm0, %v1983_v33, %v1985_v56 }
 0x14e   : > { %v1931_v17 = vsel %vm809_vm5, %v1894_v43, %v1858_v6 }
 0x14f   : > { %v1987_v21 = vrot.slane %v1931_v17, 1 }
 0x150   : > { %3347 = vmatmul.mubr.msk.bf16.gmra.mrb[44].mxu0 %vm1062_vm6, %v1984_v61  ;;  %v1786_v24 = vpop.permute.xlu0 %1785 }
 0x151   : > { %3350 = vmatprep.mubr.msk.bf16.mxu0 %vm3777_vm3, %v5327_v4  ;;  %v1896_v52 = vsel %vm774_vm4, %v4373_v1, %v1786_v24  ;;  %v1988_v53 = vsel %vm704_vm0, %v1985_v56, %v1987_v21 }
 0x154   : > { %3279 = vmatmul.mubr.msk.bf16.gmra.mrb[44].mxu1 %vm1062_vm6, %v4531_v60  ;;  %v1860_v60 = vpop.permute.xlu1 %1859  ;;  %v1788_v63 = vpop.permute.xlu0 %1787 }
 0x155   : > { %3282 = vmatprep.mubr.msk.bf16.mxu1 %vm3777_vm3, %v5327_v4  ;;  %v1933_v51 = vsel %vm809_vm5, %v1896_v52, %v1860_v60  ;;  %v1898_v1 = vsel %vm774_vm4, %v4381_v3, %v1788_v63 }
 0x156   : > { %v1989_v9 = vrot.slane %v1933_v51, 1 }
 0x158   : > { %3351 = vmatmul.mubr.msk.bf16.gmra.mrb[48].mxu0 %vm1062_vm6, %v1986_v47  ;;  %v1990_v49 = vsel %vm704_vm0, %v1987_v21, %v1989_v9  ;;  %v1790_v19 = vpop.permute.xlu0 %1789 }
 0x159   : > { %3354 = vmatprep.mubr.msk.bf16.mxu0 %vm3777_vm3, %v5327_v4  ;;  %v1900_v3 = vsel %vm774_vm4, %v4393_v23, %v1790_v19 }
 0x15c   : > { %3283 = vmatmul.mubr.msk.bf16.gmra.mrb[48].mxu1 %vm1062_vm6, %v4575_v34  ;;  %v1862_v34 = vpop.permute.xlu1 %1861  ;;  %v1792_v13 = vpop.permute.xlu0 %1791 }
 0x15d   : > { %3286 = vmatprep.mubr.msk.bf16.mxu1 %vm3777_vm3, %v5327_v4  ;;  %v1935_v36 = vsel %vm809_vm5, %v1898_v1, %v1862_v34  ;;  %v1902_v23 = vsel %vm774_vm4, %v4403_v44, %v1792_v13  ;;  %v3583_v34 = vld [vmem:[%s4008_s10 + $0x98] ss:$0 sps:$4 sm:$0x11]  }
 0x15e   : > { %v1991_v2 = vrot.slane %v1935_v36, 1  ;;  %v3584_v36 = vld [vmem:[%s4008_s10 + $0x80] sm:$0xff]  }
 0x160   : > { %3355 = vmatmul.mubr.msk.bf16.gmra.mrb[52].mxu0 %vm1062_vm6, %v1988_v53  ;;  %v1992_v10 = vsel %vm704_vm0, %v1989_v9, %v1991_v2  ;;  %v1794_v29 = vpop.permute.xlu0 %1793 }
 0x161   : > { %3358 = vmatprep.mubr.msk.bf16.mxu0 %vm3777_vm3, %v5327_v4  ;;  %v1904_v44 = vsel %vm774_vm4, %v4413_v58, %v1794_v29 }
 0x164   : > { %3287 = vmatmul.mubr.msk.bf16.gmra.mrb[52].mxu1 %vm1062_vm6, %v4607_v41  ;;  %v1864_v41 = vpop.permute.xlu1 %1863  ;;  %v1796_v31 = vpop.permute.xlu0 %1795 }
 0x165   : > { %3290 = vmatprep.mubr.msk.bf16.mxu1 %vm3777_vm3, %v5327_v4  ;;  %v1937_v62 = vsel %vm809_vm5, %v1900_v3, %v1864_v41  ;;  %v1906_v58 = vsel %vm774_vm4, %v4423_v5, %v1796_v31 }
 0x166   : > { %v1993_v18 = vrot.slane %v1937_v62, 1 }
 0x168   : > { %3359 = vmatmul.mubr.msk.bf16.gmra.mrb[56].mxu0 %vm1062_vm6, %v1990_v49  ;;  %v1994_v37 = vsel %vm704_vm0, %v1991_v2, %v1993_v18  ;;  %v1798_v35 = vpop.permute.xlu0 %1797 }
 0x169   : > { %3362 = vmatprep.mubr.msk.bf16.mxu0 %vm3777_vm3, %v5327_v4  ;;  %v1908_v5 = vsel %vm774_vm4, %v4433_v20, %v1798_v35 }
 0x16c   : > { %3291 = vmatmul.mubr.msk.bf16.gmra.mrb[56].mxu1 %vm1062_vm6, %v4635_v22  ;;  %v1866_v22 = vpop.permute.xlu1 %1865  ;;  %v1800_v33 = vpop.permute.xlu0 %1799 }
 0x16d   : > { %3294 = vmatprep.mubr.msk.bf16.mxu1 %vm3777_vm3, %v5327_v4  ;;  %v1939_v40 = vsel %vm809_vm5, %v1902_v23, %v1866_v22  ;;  %v1910_v20 = vsel %vm774_vm4, %v4441_v30, %v1800_v33 }
 0x16e   : > { %v1995_v38 = vrot.slane %v1939_v40, 1 }
 0x170   : > { %3363 = vmatmul.mubr.msk.bf16.gmra.mrb[60].mxu0 %vm1062_vm6, %v1992_v10  ;;  %v1996_v42 = vsel %vm704_vm0, %v1993_v18, %v1995_v38  ;;  %v1802_v45 = vpop.permute.xlu0 %1801 }
 0x171   : > { %3366 = vmatprep.mubr.msk.bf16.mxu0 %vm3777_vm3, %v5327_v4  ;;  %v1912_v30 = vsel %vm774_vm4, %v4453_v0, %v1802_v45 }
 0x174   : > { %3295 = vmatmul.mubr.msk.bf16.gmra.mrb[60].mxu1 %vm1062_vm6, %v4657_v50  ;;  %v1868_v50 = vpop.permute.xlu1 %1867  ;;  %v1804_v6 = vpop.permute.xlu0 %1803 }
 0x175   : > { %3298 = vmatprep.mubr.msk.bf16.mxu1 %vm3777_vm3, %v5327_v4  ;;  %v1941_v11 = vsel %vm809_vm5, %v1904_v44, %v1868_v50 }
 0x176   : > { %v1997_v48 = vrot.slane %v1941_v11, 1 }
 0x178   : > { %3367 = vmatmul.mubr.msk.bf16.gmra.mrb[64].mxu0 %vm1062_vm6, %v1994_v37  ;;  %v1998_v25 = vsel %vm704_vm0, %v1995_v38, %v1997_v48  ;;  %v1806_v52 = vpop.permute.xlu0 %1805 }
 0x179   : > { %3370 = vmatprep.mubr.msk.bf16.mxu0 %vm3777_vm3, %v5327_v4  ;;  %v1916_v53 = vsel %vm774_vm4, %v4481_v54, %v1806_v52 }
 0x17c   : > { %3299 = vmatmul.mubr.msk.bf16.gmra.mrb[64].mxu1 %vm1062_vm6, %v4676_v28  ;;  %v1870_v28 = vpop.permute.xlu1 %1869  ;;  %v1808_v51 = vpop.permute.xlu0 %1807 }
 0x17d   : > { %3302 = vmatprep.mubr.msk.bf16.mxu1 %vm3777_vm3, %v5327_v4  ;;  %v1943_v39 = vsel %vm809_vm5, %v1906_v58, %v1870_v28  ;;  %v1919_v54 = vsel %vm774_vm4, %v3583_v34, %v1808_v51 }
 0x17e   : > { %v1999_v12 = vrot.slane %v1943_v39, 1 }
 0x180   : > { %3371 = vmatmul.mubr.msk.bf16.gmra.mrb[68].mxu0 %vm1062_vm6, %v1996_v42  ;;  %v2000_v57 = vsel %vm704_vm0, %v1997_v48, %v1999_v12 }
 0x181   : > { %3374 = vmatprep.mubr.msk.bf16.mxu0 %vm3777_vm3, %v5327_v4 }
 0x184   : > { %3303 = vmatmul.mubr.msk.bf16.gmra.mrb[68].mxu1 %vm1062_vm6, %v4694_v26  ;;  %v1872_v26 = vpop.permute.xlu1 %1871 }
 0x185   : > { %3306 = vmatprep.mubr.msk.bf16.mxu1 %vm3777_vm3, %v5327_v4  ;;  %v1945_v8 = vsel %vm809_vm5, %v1908_v5, %v1872_v26 }
 0x186   : > { %v2001_v14 = vrot.slane %v1945_v8, 1 }
 0x188   : > { %3375 = vmatmul.mubr.msk.bf16.gmra.mrb[72].mxu0 %vm1062_vm6, %v1998_v25  ;;  %v2002_v55 = vsel %vm704_vm0, %v1999_v12, %v2001_v14 }
 0x189   : > { %3378 = vmatprep.mubr.msk.bf16.mxu0 %vm3777_vm3, %v5327_v4 }
 0x18c   : > { %3307 = vmatmul.mubr.msk.bf16.gmra.mrb[72].mxu1 %vm1062_vm6, %v4484_v59  ;;  %v1874_v59 = vpop.permute.xlu1 %1873 }
 0x18d   : > { %3310 = vmatprep.mubr.msk.bf16.mxu1 %vm3777_vm3, %v5327_v4  ;;  %v1947_v61 = vsel %vm809_vm5, %v1910_v20, %v1874_v59 }
 0x18e   : > { %v2003_v15 = vrot.slane %v1947_v61, 1 }
 0x190   : > { %3379 = vmatmul.mubr.msk.bf16.gmra.mrb[76].mxu0 %vm1062_vm6, %v2000_v57  ;;  %v2004_v56 = vsel %vm704_vm0, %v2001_v14, %v2003_v15 }
 0x191   : > { %3382 = vmatprep.mubr.msk.bf16.mxu0 %vm3777_vm3, %v5327_v4 }
 0x194   : > { %3311 = vmatmul.mubr.msk.bf16.gmra.mrb[76].mxu1 %vm1062_vm6, %v4504_v32  ;;  %v1876_v32 = vpop.permute.xlu1 %1875 }
 0x195   : > { %3314 = vmatprep.mubr.msk.bf16.mxu1 %vm3777_vm3, %v5327_v4  ;;  %v1949_v43 = vsel %vm809_vm5, %v1912_v30, %v1876_v32 }
 0x196   : > { %v2005_v47 = vrot.slane %v1949_v43, 1 }
 0x198   : > { %3383 = vmatmul.mubr.msk.bf16.gmra.mrb[80].mxu0 %vm1062_vm6, %v2002_v55  ;;  %v1878_v17 = vpop.permute.xlu1 %1877  ;;  %v2006_v24 = vsel %vm704_vm0, %v2003_v15, %v2005_v47 }
 0x199   : > { %3386 = vmatprep.mubr.msk.bf16.mxu0 %vm3777_vm3, %v5327_v4 }
 0x19c   : > { %3315 = vmatmul.mubr.msk.bf16.gmra.mrb[80].mxu1 %vm1062_vm6, %v4556_v27  ;;  %v5328_v27 = vld [vmem:[#allocation21_spill] sm:$0xff] }
 0x19d   : > { %3318 = vmatprep.mubr.msk.bf16.mxu1 %vm3777_vm3, %v5327_v4  ;;  %v1914_v0 = vsel %vm774_vm4, %v5328_v27, %v1804_v6 }
 0x19e   : > { %v1951_v21 = vsel %vm809_vm5, %v1914_v0, %v1878_v17 }
 0x19f   : > { %v2007_v60 = vrot.slane %v1951_v21, 1 }
 0x1a0   : > { %3387 = vmatmul.mubr.msk.bf16.gmra.mrb[84].mxu0 %vm1062_vm6, %v2004_v56 }
 0x1a1   : > { %3390 = vmatprep.mubr.msk.bf16.mxu0 %vm3777_vm3, %v5327_v4  ;;  %v2008_v63 = vsel %vm704_vm0, %v2005_v47, %v2007_v60 }
 0x1a4   : > { %3319 = vmatmul.mubr.msk.bf16.gmra.mrb[84].mxu1 %vm1062_vm6, %v4591_v7  ;;  %v1880_v7 = vpop.permute.xlu1 %1879 }
 0x1a5   : > { %3322 = vmatprep.mubr.msk.bf16.mxu1 %vm3777_vm3, %v5327_v4  ;;  %v1953_v9 = vsel %vm809_vm5, %v1916_v53, %v1880_v7 }
 0x1a6   : > { %v2009_v49 = vrot.slane %v1953_v9, 1 }
 0x1a8   : > { %3391 = vmatmul.mubr.msk.bf16.gmra.mrb[88].mxu0 %vm1062_vm6, %v2006_v24  ;;  %v700_v1 = vpop.permute.xlu1 %699  ;;  %v2010_v3 = vsel %vm704_vm0, %v2007_v60, %v2009_v49 }
 0x1a9   : > { %3394 = vmatprep.mubr.msk.bf16.mxu0 %vm3777_vm3, %v5327_v4  ;;  %v808_v19 = vsel %vm774_vm4, %v3584_v36, %v700_v1 }
 0x1ac   : > { %3323 = vmatmul.mubr.msk.bf16.gmra.mrb[88].mxu1 %vm1062_vm6, %v4622_v46  ;;  %v1882_v46 = vpop.permute.xlu0 %1881  ;;  %v773_v2 = vpop.permute.xlu1 %772 }
 0x1ad   : > { %3326 = vmatprep.mubr.msk.bf16.mxu1 %vm3777_vm3, %v5327_v4  ;;  %v1955_v41 = vsel %vm809_vm5, %v1919_v54, %v1882_v46  ;;  %v843_v10 = vsel %vm809_vm5, %v808_v19, %v773_v2 }
 0x1b0   : > { %3395 = vmatmul.mubr.msk.bf16.gmra.mrb[92].mxu0 %vm1062_vm6, %v2008_v63 }
 0x1b1   : > { %3398 = vmatprep.mubr.msk.bf16.mxu0 %vm3777_vm3, %v5327_v4 }
 0x1b4   : > { %3327 = vmatmul.mubr.msk.bf16.gmra.mrb[92].mxu1 %vm1062_vm6, %v4646_v16  ;;  %v2011_v16 = vrot.slane %v1955_v41, 1 }
 0x1b5   : > { %3330 = vmatprep.mubr.msk.bf16.mxu1 %vm3777_vm3, %v5327_v4 }
 0x1b6   : > { %v2012_v62 = vsel %vm704_vm0, %v2009_v49, %v2011_v16 }
 0x1b8   : > { %3399 = vmatmul.mubr.msk.bf16.gmra.mrb[96].mxu0 %vm1062_vm6, %v2010_v3 }
 0x1b9   : > { %3402 = vmatprep.mubr.msk.bf16.mxu0 %vm3777_vm3, %v5327_v4 }
 0x1bc   : > { %3331 = vmatmul.mubr.msk.bf16.gmra.mrb[96].mxu1 %vm1062_vm6, %v843_v10 }
 0x1c0   : > { %3403 = vmatmul.mubr.msk.bf16.gmra.mrb[100].mxu0 %vm1062_vm6, %v2012_v62 }
 0x1c9   : > { %v4911_v13 = vpop.f32.mrb[0].mxu0 }
 0x1ca   : > { %v3196_v18 = vpop.f32.mrb[1].mxu0 }
 0x1cb   : > { %v4913_v23 = vpop.f32.mrb[2].mxu0 }
 0x1cc   : > { %v3197_v22 = vpop.f32.mrb[3].mxu0 }
 0x1cf   : > { %v4915_v37 = vpop.f32.mrb[0].mxu1 }
 0x1d0   : > { %v3232_v40 = vpop.f32.mrb[1].mxu1 }
 0x1d1   : > { %v4917_v29 = vpop.f32.mrb[2].mxu1 }
 0x1d2   : > { %v3233_v38 = vpop.f32.mrb[3].mxu1 }
 0x1d3   : > { %v4919_v4 = vpop.f32.mrb[4].mxu0 }
 0x1d4   : > { %v3200_v44 = vpop.f32.mrb[5].mxu0 }
 0x1d5   : > { %v4921_v50 = vpop.f32.mrb[6].mxu0 }
 0x1d6   : > { %v3201_v42 = vpop.f32.mrb[7].mxu0 }
 0x1d7   : > { %v4923_v11 = vpop.f32.mrb[4].mxu1  ;;  %v2279_v42 = vld [vmem:[%s4012_s14] sm:$0xff] }
 0x1d8   : > { %v3236_v31 = vpop.f32.mrb[5].mxu1 }
 0x1d9   : > { %v4925_v48 = vpop.f32.mrb[6].mxu1  ;;  %v4983_v31 = vld [vmem:[%s5289_s3] ss:$0 sm:$0xff] }
 0x1da   : > { %v3237_v58 = vpop.f32.mrb[7].mxu1 }
 0x1db   : > { %v4927_v28 = vpop.f32.mrb[8].mxu0 }
 0x1dc   : > { %v3204_v25 = vpop.f32.mrb[9].mxu0 }
 0x1dd   : > { %v4929_v39 = vpop.f32.mrb[10].mxu0 }
 0x1de   : > { %v3205_v35 = vpop.f32.mrb[11].mxu0 }
 0x1df   : > { %v4931_v12 = vpop.f32.mrb[8].mxu1 }
 0x1e0   : > { %v3240_v5 = vpop.f32.mrb[9].mxu1 }
 0x1e1   : > { %v4933_v26 = vpop.f32.mrb[10].mxu1  ;;  %v2280_v5 = vld [vmem:[%s4012_s14 + $0x8] sm:$0xff] }
 0x1e2   : > { %v3241_v57 = vpop.f32.mrb[11].mxu1 }
 0x1e3   : > { %v4935_v8 = vpop.f32.mrb[12].mxu0 }
 0x1e4   : > { %v3208_v33 = vpop.f32.mrb[13].mxu0 }
 0x1e5   : > { %v4937_v14 = vpop.f32.mrb[14].mxu0 }
 0x1e6   : > { %v3209_v20 = vpop.f32.mrb[15].mxu0 }
 0x1e7   : > { %v4939_v59 = vpop.f32.mrb[12].mxu1  ;;  %v2320_v20 = vmul.f32 %v4983_v31, %v2279_v42 }
 0x1e8   : > { %v3244_v55 = vpop.f32.mrb[13].mxu1 }
 0x1e9   : > { %v4941_v61 = vpop.f32.mrb[14].mxu1 }
 0x1ea   : > { %v3245_v45 = vpop.f32.mrb[15].mxu1 }
 0x1eb   : > { %v4943_v15 = vpop.f32.mrb[16].mxu0 }
 0x1ec   : > { %v3212_v30 = vpop.f32.mrb[17].mxu0 }
 0x1ed   : > { %v4945_v32 = vpop.f32.mrb[18].mxu0 }
 0x1ee   : > { %v3213_v56 = vpop.f32.mrb[19].mxu0 }
 0x1ef   : > { %v4947_v43 = vpop.f32.mrb[16].mxu1  ;;  %v2321_v56 = vmul.f32 %v4983_v31, %v2280_v5 }
 0x1f0   : > { %v3248_v6 = vpop.f32.mrb[17].mxu1 }
 0x1f1   : > { %v4949_v47 = vpop.f32.mrb[18].mxu1 }
 0x1f2   : > { %v3249_v27 = vpop.f32.mrb[19].mxu1 }
 0x1f3   : > { %v4951_v0 = vpop.f32.mrb[20].mxu0 }
 0x1f4   : > { %v3216_v17 = vpop.f32.mrb[21].mxu0 }
 0x1f5   : > { %v4953_v24 = vpop.f32.mrb[22].mxu0 }
 0x1f6   : > { %v3217_v21 = vpop.f32.mrb[23].mxu0 }
 0x1f7   : > { %v4955_v52 = vpop.f32.mrb[20].mxu1 }
 0x1f8   : > { %v3252_v60 = vpop.f32.mrb[21].mxu1 }
 0x1f9   : > { %v4957_v7 = vpop.f32.mrb[22].mxu1  ;;  %v2281_v60 = vld [vmem:[%s4012_s14 + $0x10] sm:$0xff] }
 0x1fa   : > { %v3253_v53 = vpop.f32.mrb[23].mxu1 }
 0x1fb   : > { %v4959_v51 = vpop.f32.mrb[24].mxu0 }
 0x1fc   : > { %v3220_v63 = vpop.f32.mrb[25].mxu0 }
 0x1fd   : > { %v4961_v9 = vpop.f32.mrb[26].mxu0 }
 0x1fe   : > { %v3221_v1 = vpop.f32.mrb[27].mxu0 }
 0x1ff   : > { %v4963_v34 = vpop.f32.mrb[24].mxu1 }
 0x200   : > { %v3256_v49 = vpop.f32.mrb[25].mxu1 }
 0x201   : > { %v4965_v54 = vpop.f32.mrb[26].mxu1 }
 0x202   : > { %v3257_v46 = vpop.f32.mrb[27].mxu1 }
 0x203   : > { %v4967_v36 = vpop.f32.mrb[28].mxu0 }
 0x204   : > { %v3224_v19 = vpop.f32.mrb[29].mxu0 }
 0x205   : > { %v4969_v2 = vpop.f32.mrb[30].mxu0  ;;  %v2282_v19 = vld [vmem:[%s4012_s14 + $0x18] sm:$0xff] }
 0x206   : > { %v3225_v3 = vpop.f32.mrb[31].mxu0 }
 0x207   : > { %v4971_v41 = vpop.f32.mrb[28].mxu1 }
 0x208   : > { %v3260_v10 = vpop.f32.mrb[29].mxu1 }
 0x209   : > { %v4973_v16 = vpop.f32.mrb[30].mxu1 }
 0x20a   : > { %v3261_v62 = vpop.f32.mrb[31].mxu1 }
 0x20b   : > { %v4975_v18 = vpop.f32.mrb[32].mxu0 }
 0x20c   : > { %v3228_v22 = vpop.f32.mrb[33].mxu0 }
 0x20d   : > { %v4977_v40 = vpop.f32.mrb[34].mxu0  ;;  %v2322_v22 = vmul.f32 %v4983_v31, %v2281_v60 }
 0x20e   : > { %v3229_v38 = vpop.f32.mrb[35].mxu0 }
 0x20f   : > { %v1367_v44 = vpop.f32.mrb[32].mxu1 }
 0x210   : > { %v1368_v58 = vadd.f32 %v1367_v44, %v4911_v13  ;;  %v3268_v25 = vpop.f32.mrb[33].mxu1  ;;  %v4993_v13 = vld [vmem:[%s5288_s2] ss:$0 sm:$0xff] }
 0x211   : > { %v1370_v35 = vpop.f32.mrb[34].mxu1  ;;  %v2323_v25 = vmul.f32 %v4983_v31, %v2282_v19 }
 0x212   : > { %v1371_v57 = vadd.f32 %v1370_v35, %v4913_v23  ;;  %v3269_v33 = vpop.f32.mrb[35].mxu1 }
 0x213   : > { %v2110_v55 = vpop.f32.mrb[36].mxu0 }
 0x214   : > { %v2245_v45 = vadd.f32 %v2110_v55, %v1368_v58  ;;  %v3340_v30 = vpop.f32.mrb[37].mxu0  ;;  %v2283_v55 = vld [vmem:[%s4012_s14 + $0x20] sm:$0xff] }
 0x215   : > { %v2113_v6 = vpop.f32.mrb[38].mxu0 }
 0x216   : > { %v2354_v27 = vadd.f32 %v2320_v20, %v2245_v45  ;;  %v2246_v17 = vadd.f32 %v2113_v6, %v1371_v57  ;;  %v3341_v21 = vpop.f32.mrb[39].mxu0 }
 0x217   : > { %v1375_v23 = vpop.f32.mrb[36].mxu1 }
 0x218   : > { %v2395_v53 = vadd.f32 %v4993_v13, %v2354_v27  ;;  %v2355_v63 = vadd.f32 %v2321_v56, %v2246_v17  ;;  %v1376_v1 = vadd.f32 %v1375_v23, %v4919_v4  ;;  %v3272_v49 = vpop.f32.mrb[37].mxu1  ;;  %v2284_v17 = vld [vmem:[%s4012_s14 + $0x28] sm:$0xff] }
 0x219   : > { %v1378_v46 = vpop.f32.mrb[38].mxu1  ;;  %v2325_v19 = vmul.f32 %v4983_v31, %v2284_v17 }
 0x21a   : > { %2429 = vst [vmem:[%s4012_s14] sm:$0xff] %v2395_v53  ;;  %v2396_v3 = vadd.f32 %v4993_v13, %v2355_v63  ;;  %v1379_v10 = vadd.f32 %v1378_v46, %v4921_v50  ;;  %v3273_v62 = vpop.f32.mrb[39].mxu1  ;;  %v2463_v44 = vmax.f32 %v2395_v53, 0.0  ;;  %v2324_v53 = vmul.f32 %v4983_v31, %v2283_v55 }
 0x21b   : > { %v2118_v38 = vpop.f32.mrb[40].mxu0 }
 0x21c   : > { %2430 = vst [vmem:[%s4012_s14 + $0x8] sm:$0xff] %v2396_v3  ;;  %v2464_v42 = vmax.f32 %v2396_v3, 0.0  ;;  %v2247_v58 = vadd.f32 %v2118_v38, %v1376_v1  ;;  %v3344_v4 = vpop.f32.mrb[41].mxu0 }
 0x21d   : > { %v2121_v35 = vpop.f32.mrb[42].mxu0 }
 0x21e   : > { %v3035_v5 = vpack.c.bf16 %v2464_v42, %v2463_v44  ;;  %v2356_v57 = vadd.f32 %v2322_v22, %v2247_v58  ;;  %v2248_v33 = vadd.f32 %v2121_v35, %v1379_v10  ;;  %v3345_v50 = vpop.f32.mrb[43].mxu0  ;;  %v2285_v44 = vld [vmem:[%s4012_s14 + $0x30] sm:$0xff] }
 0x21f   : > { %v1383_v20 = vpop.f32.mrb[40].mxu1 }
 0x220   : > { %3036 = vst [vmem:[%s4010_s25] sm:$0xff] %v3035_v5   ;;  %v2397_v45 = vadd.f32 %v4993_v13, %v2356_v57  ;;  %v2357_v30 = vadd.f32 %v2323_v25, %v2248_v33  ;;  %v1384_v56 = vadd.f32 %v1383_v20, %v4927_v28  ;;  %v3276_v6 = vpop.f32.mrb[41].mxu1  ;;  %v2286_v5 = vld [vmem:[%s4012_s14 + $0x38] sm:$0xff]  ;;  %v2326_v20 = vmul.f32 %v4983_v31, %v2285_v44 }
 0x221   : > { %v1386_v27 = vpop.f32.mrb[42].mxu1  ;;  %v2327_v6 = vmul.f32 %v4983_v31, %v2286_v5 }
 0x222   : > { %2431 = vst [vmem:[%s4012_s14 + $0x10] sm:$0xff] %v2397_v45  ;;  %v2398_v21 = vadd.f32 %v4993_v13, %v2357_v30  ;;  %v1387_v23 = vadd.f32 %v1386_v27, %v4929_v39  ;;  %v3277_v60 = vpop.f32.mrb[43].mxu1  ;;  %v2465_v1 = vmax.f32 %v2397_v45, 0.0 }
 0x223   : > { %v2126_v63 = vpop.f32.mrb[44].mxu0 }
 0x224   : > { %2432 = vst [vmem:[%s4012_s14 + $0x18] sm:$0xff] %v2398_v21  ;;  %v2466_v49 = vmax.f32 %v2398_v21, 0.0  ;;  %v2249_v46 = vadd.f32 %v2126_v63, %v1384_v56  ;;  %v3348_v28 = vpop.f32.mrb[45].mxu0 }
 0x225   : > { %v2129_v3 = vpop.f32.mrb[46].mxu0 }
 0x226   : > { %v3040_v10 = vpack.c.bf16 %v2466_v49, %v2465_v1  ;;  %v2358_v62 = vadd.f32 %v2324_v53, %v2249_v46  ;;  %v2250_v22 = vadd.f32 %v2129_v3, %v1387_v23  ;;  %v3349_v39 = vpop.f32.mrb[47].mxu0  ;;  %v2287_v53 = vld [vmem:[%s4012_s14 + $0x40] sm:$0xff] }
 0x227   : > { %v1391_v38 = vpop.f32.mrb[44].mxu1 }
 0x228   : > { %3117 = vst [vmem:[%s4010_s25 + $0x8] sm:$0xff] %v3040_v10   ;;  %v2399_v42 = vadd.f32 %v4993_v13, %v2358_v62  ;;  %v2359_v58 = vadd.f32 %v2325_v19, %v2250_v22  ;;  %v1392_v4 = vadd.f32 %v1391_v38, %v4935_v8  ;;  %v3280_v25 = vpop.f32.mrb[45].mxu1  ;;  %v2288_v19 = vld [vmem:[%s4012_s14 + $0x48] sm:$0xff]  ;;  %v2328_v22 = vmul.f32 %v4983_v31, %v2287_v53 }
 0x229   : > { %v1394_v35 = vpop.f32.mrb[46].mxu1 }
 0x22a   : > { %2433 = vst [vmem:[%s4012_s14 + $0x20] sm:$0xff] %v2399_v42  ;;  %v2400_v57 = vadd.f32 %v4993_v13, %v2359_v58  ;;  %v1395_v33 = vadd.f32 %v1394_v35, %v4937_v14  ;;  %v3281_v50 = vpop.f32.mrb[47].mxu1  ;;  %v2467_v45 = vmax.f32 %v2399_v42, 0.0  ;;  %v2329_v58 = vmul.f32 %v4983_v31, %v2288_v19  ;;  %v2291_v19 = vld [vmem:[%s4012_s14 + $0x60] sm:$0xff] }
 0x22b   : > { %v2134_v55 = vpop.f32.mrb[48].mxu0 }
 0x22c   : > { %2434 = vst [vmem:[%s4012_s14 + $0x28] sm:$0xff] %v2400_v57  ;;  %v2468_v30 = vmax.f32 %v2400_v57, 0.0  ;;  %v2251_v56 = vadd.f32 %v2134_v55, %v1392_v4  ;;  %v3352_v8 = vpop.f32.mrb[49].mxu0 }
 0x22d   : > { %v2137_v27 = vpop.f32.mrb[50].mxu0 }
 0x22e   : > { %v3045_v17 = vpack.c.bf16 %v2468_v30, %v2467_v45  ;;  %v2360_v21 = vadd.f32 %v2326_v20, %v2251_v56  ;;  %v2252_v23 = vadd.f32 %v2137_v27, %v1395_v33  ;;  %v3353_v14 = vpop.f32.mrb[51].mxu0  ;;  %v2289_v33 = vld [vmem:[%s4012_s14 + $0x50] sm:$0xff]  ;;  %v2290_v56 = vld [vmem:[%s4012_s14 + $0x58] sm:$0xff] }
 0x22f   : > { %v1399_v60 = vpop.f32.mrb[48].mxu1  ;;  %v2331_v53 = vmul.f32 %v4983_v31, %v2290_v56 }
 0x230   : > { %3118 = vst [vmem:[%s4010_s25 + $0x10] sm:$0xff] %v3045_v17   ;;  %v2401_v63 = vadd.f32 %v4993_v13, %v2360_v21  ;;  %v2361_v1 = vadd.f32 %v2327_v6, %v2252_v23  ;;  %v1400_v49 = vadd.f32 %v1399_v60, %v4943_v15  ;;  %v3284_v46 = vpop.f32.mrb[49].mxu1  ;;  %v2330_v17 = vmul.f32 %v4983_v31, %v2289_v33 }
 0x231   : > { %v1402_v28 = vpop.f32.mrb[50].mxu1 }
 0x232   : > { %2435 = vst [vmem:[%s4012_s14 + $0x30] sm:$0xff] %v2401_v63  ;;  %v2402_v3 = vadd.f32 %v4993_v13, %v2361_v1  ;;  %v1403_v10 = vadd.f32 %v1402_v28, %v4945_v32  ;;  %v3285_v62 = vpop.f32.mrb[51].mxu1  ;;  %v2469_v38 = vmax.f32 %v2401_v63, 0.0 }
 0x233   : > { %v2142_v39 = vpop.f32.mrb[52].mxu0 }
 0x234   : > { %2436 = vst [vmem:[%s4012_s14 + $0x38] sm:$0xff] %v2402_v3  ;;  %v2470_v44 = vmax.f32 %v2402_v3, 0.0  ;;  %v2253_v42 = vadd.f32 %v2142_v39, %v1400_v49  ;;  %v3356_v15 = vpop.f32.mrb[53].mxu0 }
 0x235   : > { %v2145_v4 = vpop.f32.mrb[54].mxu0 }
 0x236   : > { %v3050_v25 = vpack.c.bf16 %v2470_v44, %v2469_v38  ;;  %v2362_v35 = vadd.f32 %v2328_v22, %v2253_v42  ;;  %v2254_v5 = vadd.f32 %v2145_v4, %v1403_v10  ;;  %v3357_v32 = vpop.f32.mrb[55].mxu0  ;;  %v2292_v38 = vld [vmem:[%s4012_s14 + $0x68] sm:$0xff] }
 0x237   : > { %v1407_v57 = vpop.f32.mrb[52].mxu1  ;;  %v2333_v32 = vmul.f32 %v4983_v31, %v2292_v38 }
 0x238   : > { %3119 = vst [vmem:[%s4010_s25 + $0x18] sm:$0xff] %v3050_v25   ;;  %v2403_v50 = vadd.f32 %v4993_v13, %v2362_v35  ;;  %v2363_v20 = vadd.f32 %v2329_v58, %v2254_v5  ;;  %v1408_v55 = vadd.f32 %v1407_v57, %v4951_v0  ;;  %v3288_v45 = vpop.f32.mrb[53].mxu1  ;;  %v2332_v58 = vmul.f32 %v4983_v31, %v2291_v19 }
 0x239   : > { %v1410_v30 = vpop.f32.mrb[54].mxu1  ;;  %v2293_v45 = vld [vmem:[%s4012_s14 + $0x70] sm:$0xff] }
 0x23a   : > { %2437 = vst [vmem:[%s4012_s14 + $0x40] sm:$0xff] %v2403_v50  ;;  %v2404_v8 = vadd.f32 %v4993_v13, %v2363_v20  ;;  %v1411_v6 = vadd.f32 %v1410_v30, %v4953_v24  ;;  %v3289_v27 = vpop.f32.mrb[55].mxu1  ;;  %v2471_v23 = vmax.f32 %v2403_v50, 0.0 }
 0x23b   : > { %v2150_v21 = vpop.f32.mrb[56].mxu0 }
 0x23c   : > { %2438 = vst [vmem:[%s4012_s14 + $0x48] sm:$0xff] %v2404_v8  ;;  %v2472_v14 = vmax.f32 %v2404_v8, 0.0  ;;  %v2255_v60 = vadd.f32 %v2150_v21, %v1408_v55  ;;  %v3360_v0 = vpop.f32.mrb[57].mxu0 }
 0x23d   : > { %v2153_v63 = vpop.f32.mrb[58].mxu0 }
 0x23e   : > { %v3055_v1 = vpack.c.bf16 %v2472_v14, %v2471_v23  ;;  %v2364_v49 = vadd.f32 %v2330_v17, %v2255_v60  ;;  %v2256_v46 = vadd.f32 %v2153_v63, %v1411_v6  ;;  %v3361_v24 = vpop.f32.mrb[59].mxu0  ;;  %v2294_v17 = vld [vmem:[%s4012_s14 + $0x78] sm:$0xff]  ;;  %v2334_v60 = vmul.f32 %v4983_v31, %v2293_v45  ;;  %v2297_v45 = vld [vmem:[%s4012_s14 + $0x90] sm:$0xff] }
 0x23f   : > { %v1415_v28 = vpop.f32.mrb[56].mxu1 }
 0x240   : > { %3120 = vst [vmem:[%s4010_s25 + $0x20] sm:$0xff] %v3055_v1   ;;  %v2405_v3 = vadd.f32 %v4993_v13, %v2364_v49  ;;  %v2365_v10 = vadd.f32 %v2331_v53, %v2256_v46  ;;  %v1416_v62 = vadd.f32 %v1415_v28, %v4959_v51  ;;  %v3292_v22 = vpop.f32.mrb[57].mxu1  ;;  %v2335_v49 = vmul.f32 %v4983_v31, %v2294_v17  ;;  %v2298_v17 = vld [vmem:[%s4012_s14 + $0x98] sm:$0xff] }
 0x241   : > { %v1418_v39 = vpop.f32.mrb[58].mxu1 }
 0x242   : > { %2439 = vst [vmem:[%s4012_s14 + $0x50] sm:$0xff] %v2405_v3  ;;  %v2406_v44 = vadd.f32 %v4993_v13, %v2365_v10  ;;  %v1419_v42 = vadd.f32 %v1418_v39, %v4961_v9  ;;  %v3293_v15 = vpop.f32.mrb[59].mxu1  ;;  %v2473_v25 = vmax.f32 %v2405_v3, 0.0  ;;  %v2295_v10 = vld [vmem:[%s4012_s14 + $0x80] sm:$0xff] }
 0x243   : > { %v2158_v4 = vpop.f32.mrb[60].mxu0 }
 0x244   : > { %2440 = vst [vmem:[%s4012_s14 + $0x58] sm:$0xff] %v2406_v44  ;;  %v2474_v35 = vmax.f32 %v2406_v44, 0.0  ;;  %v2257_v5 = vadd.f32 %v2158_v4, %v1416_v62  ;;  %v3364_v51 = vpop.f32.mrb[61].mxu0 }
 0x245   : > { %v2161_v57 = vpop.f32.mrb[62].mxu0 }
 0x246   : > { %v3060_v33 = vpack.c.bf16 %v2474_v35, %v2473_v25  ;;  %v2366_v50 = vadd.f32 %v2332_v58, %v2257_v5  ;;  %v2258_v20 = vadd.f32 %v2161_v57, %v1419_v42  ;;  %v3365_v9 = vpop.f32.mrb[63].mxu0  ;;  %v2296_v42 = vld [vmem:[%s4012_s14 + $0x88] sm:$0xff]  ;;  %v2336_v25 = vmul.f32 %v4983_v31, %v2295_v10 }
 0x247   : > { %v1423_v55 = vpop.f32.mrb[60].mxu1  ;;  %v2337_v57 = vmul.f32 %v4983_v31, %v2296_v42 }
 0x248   : > { %3121 = vst [vmem:[%s4010_s25 + $0x28] sm:$0xff] %v3060_v33   ;;  %v2407_v30 = vadd.f32 %v4993_v13, %v2366_v50  ;;  %v2367_v56 = vadd.f32 %v2333_v32, %v2258_v20  ;;  %v1424_v8 = vadd.f32 %v1423_v55, %v4967_v36  ;;  %v3296_v6 = vpop.f32.mrb[61].mxu1 }
 0x249   : > { %v1426_v27 = vpop.f32.mrb[62].mxu1 }
 0x24a   : > { %2441 = vst [vmem:[%s4012_s14 + $0x60] sm:$0xff] %v2407_v30  ;;  %v2408_v21 = vadd.f32 %v4993_v13, %v2367_v56  ;;  %v1427_v23 = vadd.f32 %v1426_v27, %v4969_v2  ;;  %v3297_v14 = vpop.f32.mrb[63].mxu1  ;;  %v2475_v53 = vmax.f32 %v2407_v30, 0.0 }
 0x24b   : > { %v2166_v0 = vpop.f32.mrb[64].mxu0 }
 0x24c   : > { %2442 = vst [vmem:[%s4012_s14 + $0x68] sm:$0xff] %v2408_v21  ;;  %v2476_v63 = vmax.f32 %v2408_v21, 0.0  ;;  %v2259_v1 = vadd.f32 %v2166_v0, %v1424_v8  ;;  %v3368_v36 = vpop.f32.mrb[65].mxu0 }
 0x24d   : > { %v2169_v46 = vpop.f32.mrb[66].mxu0  ;;  %v2339_v36 = vmul.f32 %v4983_v31, %v2298_v17 }
 0x24e   : > { %v3065_v24 = vpack.c.bf16 %v2476_v63, %v2475_v53  ;;  %v2368_v28 = vadd.f32 %v2334_v60, %v2259_v1  ;;  %v2260_v19 = vadd.f32 %v2169_v46, %v1427_v23  ;;  %v3369_v2 = vpop.f32.mrb[67].mxu0  ;;  %v2338_v60 = vmul.f32 %v4983_v31, %v2297_v45 }
 0x24f   : > { %v1431_v3 = vpop.f32.mrb[64].mxu1  ;;  %v2299_v2 = vld [vmem:[%s4012_s14 + $0xa0] sm:$0xff] }
 0x250   : > { %3122 = vst [vmem:[%s4010_s25 + $0x30] sm:$0xff] %v3065_v24   ;;  %v2409_v62 = vadd.f32 %v4993_v13, %v2368_v28  ;;  %v2369_v22 = vadd.f32 %v2335_v49, %v2260_v19  ;;  %v1432_v39 = vadd.f32 %v1431_v3, %v4975_v18  ;;  %v3300_v38 = vpop.f32.mrb[65].mxu1 }
 0x251   : > { %v1434_v44 = vpop.f32.mrb[66].mxu1  ;;  %v2300_v38 = vld [vmem:[%s4012_s14 + $0xa8] sm:$0xff] }
 0x252   : > { %2443 = vst [vmem:[%s4012_s14 + $0x70] sm:$0xff] %v2409_v62  ;;  %v2410_v15 = vadd.f32 %v4993_v13, %v2369_v22  ;;  %v1435_v58 = vadd.f32 %v1434_v44, %v4977_v40  ;;  %v3301_v4 = vpop.f32.mrb[67].mxu1  ;;  %v2477_v5 = vmax.f32 %v2409_v62, 0.0 }
 0x253   : > { %v2174_v35 = vpop.f32.mrb[68].mxu0 }
 0x254   : > { %2444 = vst [vmem:[%s4012_s14 + $0x78] sm:$0xff] %v2410_v15  ;;  %v2478_v51 = vmax.f32 %v2410_v15, 0.0  ;;  %v2261_v32 = vadd.f32 %v2174_v35, %v1432_v39  ;;  %v3372_v18 = vpop.f32.mrb[69].mxu0 }
 0x255   : > { %v2177_v33 = vpop.f32.mrb[70].mxu0 }
 0x256   : > { %v3070_v50 = vpack.c.bf16 %v2478_v51, %v2477_v5  ;;  %v2370_v20 = vadd.f32 %v2336_v25, %v2261_v32  ;;  %v2262_v9 = vadd.f32 %v2177_v33, %v1435_v58  ;;  %v3373_v40 = vpop.f32.mrb[71].mxu0  ;;  %v2340_v58 = vmul.f32 %v4983_v31, %v2299_v2  ;;  %v2304_v2 = vld [vmem:[%s4012_s14 + $0xc8] sm:$0xff] }
 0x257   : > { %v1439_v55 = vpop.f32.mrb[68].mxu1  ;;  %v2341_v51 = vmul.f32 %v4983_v31, %v2300_v38 }
 0x258   : > { %3123 = vst [vmem:[%s4010_s25 + $0x38] sm:$0xff] %v3070_v50   ;;  %v2411_v30 = vadd.f32 %v4993_v13, %v2370_v20  ;;  %v2371_v56 = vadd.f32 %v2337_v57, %v2262_v9  ;;  %v1440_v8 = vadd.f32 %v1439_v55, %v4915_v37  ;;  %v3304_v6 = vpop.f32.mrb[69].mxu1  ;;  %v2301_v20 = vld [vmem:[%s4012_s14 + $0xb0] sm:$0xff] }
 0x259   : > { %v1442_v27 = vpop.f32.mrb[70].mxu1  ;;  %v2342_v17 = vmul.f32 %v4983_v31, %v2301_v20 }
 0x25a   : > { %2445 = vst [vmem:[%s4012_s14 + $0x80] sm:$0xff] %v2411_v30  ;;  %v2412_v21 = vadd.f32 %v4993_v13, %v2371_v56  ;;  %v1443_v23 = vadd.f32 %v1442_v27, %v4917_v29  ;;  %v3305_v14 = vpop.f32.mrb[71].mxu1  ;;  %v2479_v53 = vmax.f32 %v2411_v30, 0.0  ;;  %v2302_v56 = vld [vmem:[%s4012_s14 + $0xb8] sm:$0xff] }
 0x25b   : > { %v2182_v0 = vpop.f32.mrb[72].mxu0 }
 0x25c   : > { %2446 = vst [vmem:[%s4012_s14 + $0x88] sm:$0xff] %v2412_v21  ;;  %v2480_v63 = vmax.f32 %v2412_v21, 0.0  ;;  %v2263_v1 = vadd.f32 %v2182_v0, %v1440_v8  ;;  %v3376_v37 = vpop.f32.mrb[73].mxu0  ;;  %v2343_v0 = vmul.f32 %v4983_v31, %v2302_v56 }
 0x25d   : > { %v2185_v49 = vpop.f32.mrb[74].mxu0 }
 0x25e   : > { %v3075_v46 = vpack.c.bf16 %v2480_v63, %v2479_v53  ;;  %v2372_v24 = vadd.f32 %v2338_v60, %v2263_v1  ;;  %v2264_v28 = vadd.f32 %v2185_v49, %v1443_v23  ;;  %v3377_v29 = vpop.f32.mrb[75].mxu0  ;;  %v2303_v49 = vld [vmem:[%s4012_s14 + $0xc0] sm:$0xff] }
 0x25f   : > { %v1447_v19 = vpop.f32.mrb[72].mxu1 }
 0x260   : > { %3124 = vst [vmem:[%s4010_s25 + $0x40] sm:$0xff] %v3075_v46   ;;  %v2413_v3 = vadd.f32 %v4993_v13, %v2372_v24  ;;  %v2373_v10 = vadd.f32 %v2339_v36, %v2264_v28  ;;  %v1448_v62 = vadd.f32 %v1447_v19, %v4923_v11  ;;  %v3308_v22 = vpop.f32.mrb[73].mxu1 }
 0x261   : > { %v1450_v39 = vpop.f32.mrb[74].mxu1  ;;  %v2344_v22 = vmul.f32 %v4983_v31, %v2303_v49 }
 0x262   : > { %2447 = vst [vmem:[%s4012_s14 + $0x90] sm:$0xff] %v2413_v3  ;;  %v2414_v44 = vadd.f32 %v4993_v13, %v2373_v10  ;;  %v1451_v42 = vadd.f32 %v1450_v39, %v4925_v48  ;;  %v3309_v15 = vpop.f32.mrb[75].mxu1  ;;  %v2481_v25 = vmax.f32 %v2413_v3, 0.0 }
 0x263   : > { %v2190_v4 = vpop.f32.mrb[76].mxu0  ;;  %v2345_v15 = vmul.f32 %v4983_v31, %v2304_v2 }
 0x264   : > { %2448 = vst [vmem:[%s4012_s14 + $0x98] sm:$0xff] %v2414_v44  ;;  %v2482_v35 = vmax.f32 %v2414_v44, 0.0  ;;  %v2265_v5 = vadd.f32 %v2190_v4, %v1448_v62  ;;  %v3380_v11 = vpop.f32.mrb[77].mxu0 }
 0x265   : > { %v2193_v32 = vpop.f32.mrb[78].mxu0  ;;  %v2305_v11 = vld [vmem:[%s4012_s14 + $0xd0] sm:$0xff] }
 0x266   : > { %v3080_v18 = vpack.c.bf16 %v2482_v35, %v2481_v25  ;;  %v2374_v57 = vadd.f32 %v2340_v58, %v2265_v5  ;;  %v2266_v33 = vadd.f32 %v2193_v32, %v1451_v42  ;;  %v3381_v48 = vpop.f32.mrb[79].mxu0 }
 0x267   : > { %v1455_v50 = vpop.f32.mrb[76].mxu1  ;;  %v2306_v48 = vld [vmem:[%s4012_s14 + $0xd8] sm:$0xff] }
 0x268   : > { %3125 = vst [vmem:[%s4010_s25 + $0x48] sm:$0xff] %v3080_v18   ;;  %v2415_v9 = vadd.f32 %v4993_v13, %v2374_v57  ;;  %v2375_v40 = vadd.f32 %v2341_v51, %v2266_v33  ;;  %v1456_v55 = vadd.f32 %v1455_v50, %v4931_v12  ;;  %v3312_v45 = vpop.f32.mrb[77].mxu1 }
 0x269   : > { %v1458_v30 = vpop.f32.mrb[78].mxu1 }
 0x26a   : > { %2449 = vst [vmem:[%s4012_s14 + $0xa0] sm:$0xff] %v2415_v9  ;;  %v2416_v8 = vadd.f32 %v4993_v13, %v2375_v40  ;;  %v1459_v6 = vadd.f32 %v1458_v30, %v4933_v26  ;;  %v3313_v27 = vpop.f32.mrb[79].mxu1  ;;  %v2483_v23 = vmax.f32 %v2415_v9, 0.0  ;;  %v2346_v40 = vmul.f32 %v4983_v31, %v2305_v11 }
 0x26b   : > { %v2198_v21 = vpop.f32.mrb[80].mxu0 }
 0x26c   : > { %2450 = vst [vmem:[%s4012_s14 + $0xa8] sm:$0xff] %v2416_v8  ;;  %v2484_v14 = vmax.f32 %v2416_v8, 0.0  ;;  %v2267_v60 = vadd.f32 %v2198_v21, %v1456_v55  ;;  %v3384_v12 = vpop.f32.mrb[81].mxu0  ;;  %v2347_v8 = vmul.f32 %v4983_v31, %v2306_v48 }
 0x26d   : > { %v2201_v53 = vpop.f32.mrb[82].mxu0 }
 0x26e   : > { %v3085_v63 = vpack.c.bf16 %v2484_v14, %v2483_v23  ;;  %v2376_v1 = vadd.f32 %v2342_v17, %v2267_v60  ;;  %v2268_v37 = vadd.f32 %v2201_v53, %v1459_v6  ;;  %v3385_v26 = vpop.f32.mrb[83].mxu0  ;;  %v2307_v14 = vld [vmem:[%s4012_s14 + $0xe0] sm:$0xff] }
 0x26f   : > { %v1463_v36 = vpop.f32.mrb[80].mxu1  ;;  %v2348_v49 = vmul.f32 %v4983_v31, %v2307_v14 }
 0x270   : > { %3126 = vst [vmem:[%s4010_s25 + $0x50] sm:$0xff] %v3085_v63   ;;  %v2417_v46 = vadd.f32 %v4993_v13, %v2376_v1  ;;  %v2377_v24 = vadd.f32 %v2343_v0, %v2268_v37  ;;  %v1464_v28 = vadd.f32 %v1463_v36, %v4939_v59  ;;  %v3316_v29 = vpop.f32.mrb[81].mxu1  ;;  %v2308_v1 = vld [vmem:[%s4012_s14 + $0xe8] sm:$0xff] }
 0x271   : > { %v1466_v19 = vpop.f32.mrb[82].mxu1 }
 0x272   : > { %2451 = vst [vmem:[%s4012_s14 + $0xb0] sm:$0xff] %v2417_v46  ;;  %v2418_v3 = vadd.f32 %v4993_v13, %v2377_v24  ;;  %v1467_v10 = vadd.f32 %v1466_v19, %v4941_v61  ;;  %v3317_v62 = vpop.f32.mrb[83].mxu1  ;;  %v2485_v38 = vmax.f32 %v2417_v46, 0.0  ;;  %v2349_v19 = vmul.f32 %v4983_v31, %v2308_v1 }
 0x273   : > { %v2206_v39 = vpop.f32.mrb[84].mxu0 }
 0x274   : > { %2452 = vst [vmem:[%s4012_s14 + $0xb8] sm:$0xff] %v2418_v3  ;;  %v2486_v44 = vmax.f32 %v2418_v3, 0.0  ;;  %v2269_v42 = vadd.f32 %v2206_v39, %v1464_v28  ;;  %v3388_v59 = vpop.f32.mrb[85].mxu0  ;;  %v2309_v39 = vld [vmem:[%s4012_s14 + $0xf0] sm:$0xff] }
 0x275   : > { %v2209_v58 = vpop.f32.mrb[86].mxu0 }
 0x276   : > { %v3090_v4 = vpack.c.bf16 %v2486_v44, %v2485_v38  ;;  %v2378_v25 = vadd.f32 %v2344_v22, %v2269_v42  ;;  %v2270_v35 = vadd.f32 %v2209_v58, %v1467_v10  ;;  %v3389_v61 = vpop.f32.mrb[87].mxu0  ;;  %v2310_v58 = vld [vmem:[%s4012_s14 + $0xf8] sm:$0xff] }
 0x277   : > { %v1471_v5 = vpop.f32.mrb[84].mxu1  ;;  %v2350_v61 = vmul.f32 %v4983_v31, %v2309_v39 }
 0x278   : > { %3127 = vst [vmem:[%s4010_s25 + $0x58] sm:$0xff] %v3090_v4   ;;  %v2419_v51 = vadd.f32 %v4993_v13, %v2378_v25  ;;  %v2379_v32 = vadd.f32 %v2345_v15, %v2270_v35  ;;  %v1472_v18 = vadd.f32 %v1471_v5, %v4947_v43  ;;  %v3320_v57 = vpop.f32.mrb[85].mxu1 }
 0x279   : > { %v1474_v33 = vpop.f32.mrb[86].mxu1 }
 0x27a   : > { %2453 = vst [vmem:[%s4012_s14 + $0xc0] sm:$0xff] %v2419_v51  ;;  %v2420_v50 = vadd.f32 %v4993_v13, %v2379_v32  ;;  %v1475_v20 = vadd.f32 %v1474_v33, %v4949_v47  ;;  %v3321_v9 = vpop.f32.mrb[87].mxu1  ;;  %v2487_v45 = vmax.f32 %v2419_v51, 0.0 }
 0x27b   : > { %v2214_v55 = vpop.f32.mrb[88].mxu0  ;;  %v2311_v9 = vld [vmem:[%s4012_s14 + $0x100] sm:$0xff] }
 0x27c   : > { %2454 = vst [vmem:[%s4012_s14 + $0xc8] sm:$0xff] %v2420_v50  ;;  %v2488_v30 = vmax.f32 %v2420_v50, 0.0  ;;  %v2271_v56 = vadd.f32 %v2214_v55, %v1472_v18  ;;  %v3392_v43 = vpop.f32.mrb[89].mxu0  ;;  %v2351_v18 = vmul.f32 %v4983_v31, %v2310_v58 }
 0x27d   : > { %v2217_v6 = vpop.f32.mrb[90].mxu0  ;;  %v2312_v43 = vld [vmem:[%s4012_s14 + $0x108] sm:$0xff] }
 0x27e   : > { %v3095_v27 = vpack.c.bf16 %v2488_v30, %v2487_v45  ;;  %v2380_v17 = vadd.f32 %v2346_v40, %v2271_v56  ;;  %v2272_v21 = vadd.f32 %v2217_v6, %v1475_v20  ;;  %v3393_v47 = vpop.f32.mrb[91].mxu0 }
 0x27f   : > { %v1479_v23 = vpop.f32.mrb[88].mxu1 }
 0x280   : > { %3128 = vst [vmem:[%s4010_s25 + $0x60] sm:$0xff] %v3095_v27   ;;  %v2421_v60 = vadd.f32 %v4993_v13, %v2380_v17  ;;  %v2381_v12 = vadd.f32 %v2347_v8, %v2272_v21  ;;  %v1480_v0 = vadd.f32 %v1479_v23, %v4955_v52  ;;  %v3324_v53 = vpop.f32.mrb[89].mxu1  ;;  %v2352_v17 = vmul.f32 %v4983_v31, %v2311_v9 }
 0x281   : > { %v1482_v63 = vpop.f32.mrb[90].mxu1 }
 0x282   : > { %2455 = vst [vmem:[%s4012_s14 + $0xd0] sm:$0xff] %v2421_v60  ;;  %v2422_v37 = vadd.f32 %v4993_v13, %v2381_v12  ;;  %v1483_v26 = vadd.f32 %v1482_v63, %v4957_v7  ;;  %v3325_v36 = vpop.f32.mrb[91].mxu1  ;;  %v2489_v24 = vmax.f32 %v2421_v60, 0.0  ;;  %v2353_v60 = vmul.f32 %v4983_v31, %v2312_v43 }
 0x283   : > { %v2222_v46 = vpop.f32.mrb[92].mxu0 }
 0x284   : > { %2456 = vst [vmem:[%s4012_s14 + $0xd8] sm:$0xff] %v2422_v37  ;;  %v2490_v28 = vmax.f32 %v2422_v37, 0.0  ;;  %v2273_v29 = vadd.f32 %v2222_v46, %v1480_v0  ;;  %v3396_v52 = vpop.f32.mrb[93].mxu0 }
 0x285   : > { %v2225_v2 = vpop.f32.mrb[94].mxu0 }
 0x286   : > { %v3100_v3 = vpack.c.bf16 %v2490_v28, %v2489_v24  ;;  %v2382_v10 = vadd.f32 %v2348_v49, %v2273_v29  ;;  %v2274_v62 = vadd.f32 %v2225_v2, %v1483_v26  ;;  %v3397_v7 = vpop.f32.mrb[95].mxu0 }
 0x287   : > { %v1487_v22 = vpop.f32.mrb[92].mxu1 }
 0x288   : > { %3129 = vst [vmem:[%s4010_s25 + $0x68] sm:$0xff] %v3100_v3   ;;  %v2423_v38 = vadd.f32 %v4993_v13, %v2382_v10  ;;  %v2383_v44 = vadd.f32 %v2349_v19, %v2274_v62  ;;  %v1488_v42 = vadd.f32 %v1487_v22, %v4963_v34  ;;  %v3328_v59 = vpop.f32.mrb[93].mxu1 }
 0x289   : > { %v1490_v15 = vpop.f32.mrb[94].mxu1 }
 0x28a   : > { %2457 = vst [vmem:[%s4012_s14 + $0xe0] sm:$0xff] %v2423_v38  ;;  %v2424_v4 = vadd.f32 %v4993_v13, %v2383_v44  ;;  %v1491_v25 = vadd.f32 %v1490_v15, %v4965_v54  ;;  %v3329_v35 = vpop.f32.mrb[95].mxu1  ;;  %v2491_v11 = vmax.f32 %v2423_v38, 0.0 }
 0x28b   : > { %v2230_v5 = vpop.f32.mrb[96].mxu0 }
 0x28c   : > { %2458 = vst [vmem:[%s4012_s14 + $0xe8] sm:$0xff] %v2424_v4  ;;  %v2492_v51 = vmax.f32 %v2424_v4, 0.0  ;;  %v2275_v32 = vadd.f32 %v2230_v5, %v1488_v42  ;;  %v3400_v34 = vpop.f32.mrb[97].mxu0 }
 0x28d   : > { %v2233_v57 = vpop.f32.mrb[98].mxu0 }
 0x28e   : > { %v3105_v33 = vpack.c.bf16 %v2492_v51, %v2491_v11  ;;  %v2384_v54 = vadd.f32 %v2350_v61, %v2275_v32  ;;  %v2276_v48 = vadd.f32 %v2233_v57, %v1491_v25  ;;  %v3401_v50 = vpop.f32.mrb[99].mxu0 }
 0x28f   : > { %v1495_v20 = vpop.f32.mrb[96].mxu1 }
 0x290   : > { %3130 = vst [vmem:[%s4010_s25 + $0x70] sm:$0xff] %v3105_v33   ;;  %v2425_v40 = vadd.f32 %v4993_v13, %v2384_v54  ;;  %v2385_v55 = vadd.f32 %v2351_v18, %v2276_v48  ;;  %v1496_v45 = vadd.f32 %v1495_v20, %v4971_v41  ;;  %v3332_v30 = vpop.f32.mrb[97].mxu1 }
 0x291   : > { %v1498_v56 = vpop.f32.mrb[98].mxu1 }
 0x292   : > { %2459 = vst [vmem:[%s4012_s14 + $0xf0] sm:$0xff] %v2425_v40  ;;  %v2426_v8 = vadd.f32 %v4993_v13, %v2385_v55  ;;  %v1499_v6 = vadd.f32 %v1498_v56, %v4973_v16  ;;  %v3333_v27 = vpop.f32.mrb[99].mxu1  ;;  %v2493_v47 = vmax.f32 %v2425_v40, 0.0 }
 0x293   : > { %v2238_v21 = vpop.f32.mrb[100].mxu0 }
 0x294   : > { %2460 = vst [vmem:[%s4012_s14 + $0xf8] sm:$0xff] %v2426_v8  ;;  %v2494_v41 = vmax.f32 %v2426_v8, 0.0  ;;  %v2277_v23 = vadd.f32 %v2238_v21, %v1496_v45  ;;  %v3404_v14 = vpop.f32.mrb[101].mxu0 }
 0x295   : > { %v2241_v12 = vpop.f32.mrb[102].mxu0 }
 0x296   : > { %v3110_v16 = vpack.c.bf16 %v2494_v41, %v2493_v47  ;;  %v2386_v0 = vadd.f32 %v2352_v17, %v2277_v23  ;;  %v2278_v53 = vadd.f32 %v2241_v12, %v1499_v6  ;;  %v3405_v63 = vpop.f32.mrb[103].mxu0 }
 0x298   : > { %3131 = vst [vmem:[%s4010_s25 + $0x78] sm:$0xff] %v3110_v16   ;;  %v2427_v1 = vadd.f32 %v4993_v13, %v2386_v0  ;;  %v2387_v37 = vadd.f32 %v2353_v60, %v2278_v53 }
 0x29a   : > { %2461 = vst [vmem:[%s4012_s14 + $0x100] sm:$0xff] %v2427_v1  ;;  %v2428_v31 = vadd.f32 %v4993_v13, %v2387_v37  ;;  %v2495_v26 = vmax.f32 %v2427_v1, 0.0 }
 0x29c   : > { %2462 = vst [vmem:[%s4012_s14 + $0x108] sm:$0xff] %v2428_v31  ;;  %v2496_v36 = vmax.f32 %v2428_v31, 0.0 }
 0x29d   : > { %3628 = shalt.err (!%p3625_p1)
}
 0x29e   : > { %s3629_s14 = scalar_lea.hbm %s5180_s4, 4352  ;;  %s3633_s28 = scalar_lea.hbm %s5292_s6, 8704 }
 0x29f   : > { %p3630_p5 = scmp.ne.s32.totalorder %s5180_s4, %s3629_s14  ;;  %p3634_p12 = scmp.lt.u32.totalorder %s5180_s4, %s5292_s6 }
 0x2a0   : > { %p3635_p2 = scmp.lt.u32.totalorder %s3633_s28, %s3629_s14  ;;  %p3637_p10 = scmp.lt.u32.totalorder %s3629_s14, %s5180_s4 }
 0x2a1   : > { %p3631_p6 = pnand %p3630_p5, %p5329_p11 }
 0x2a2   : > { %p3636_p7 = por %p3635_p2, %p3634_p12 }
 0x2a3   : > { %p3632_p4 = pneg %p3631_p6 }
 0x2a4   : > { %p3638_p8 = por %p3637_p10, %p3636_p7 }
 0x2a6   : > { %p3639_p3 = pnand %p3638_p8, %p3632_p4 }
 0x2a8   : > { %3642 = shalt.err (!%p3639_p3)
}
 0x2a9   : > { %s3779_s30 = smov 128   ;;  %v3115_v13 = vpack.c.bf16 %v2496_v36, %v2495_v26  ;;  %s5222_s17 = scalar_lea.sflag [#allocation4], %s310_s26 }
 0x2aa   : > { %3422 = dma.vmem_to_hbm [thread:$0]  (%p5329_p11), %s5184_s16, 4352, %s5180_s4, %s2673_s23, %s3779_s30, %s3779_s30, %s3775_s15  }
 0x2ab   : > { %3132 = vst [vmem:[%s4010_s25 + $0x80] sm:$0xff] %v3115_v13   ;;  %s3643_s9 = scalar_lea.vmem %s5192_s20, 2176  ;;  %p5330_p13 = scmp.ne.s32.totalorder %s5316_s19, 0 }
 0x2ac   : > { %p3644_p9 = scmp.ne.s32.totalorder %s5192_s20, %s3643_s9  ;;  %s3780_s11 = smov [#allocation5]  }
 0x2ad   : > { %s3647_s18 = sshll.u32 %s3780_s11, 4  ;;  %s3648_s18 = int_to_ptr.vmem [resolvable:$false] %s3647_s18 }
 0x2ae   : > { %p3645_p0 = pnand %p3644_p9, %p5330_p13  ;;  %s3649_s14 = scalar_lea.vmem %s3648_s18, 4352 }
 0x2af   : > { %p3650_p5 = scmp.lt.s32.totalorder %s5192_s20, %s3648_s18  ;;  %p3651_p6 = scmp.lt.s32.totalorder %s3649_s14, %s3643_s9 }
 0x2b0   : > { %p3646_p1 = pneg %p3645_p0 }
 0x2b1   : > { %p3652_p4 = por %p3651_p6, %p3650_p5 }
 0x2b3   : > { %p3653_p12 = pnand %p3652_p4, %p3646_p1 }
 0x2b5   : > { %3656 = shalt.err (!%p3653_p12)
}
 0x2b6   : > { %s3657_s25 = scalar_lea.hbm %s5190_s29, 2176  ;;  %s3661_s16 = scalar_lea.hbm %s5291_s5, 13056 }
 0x2b7   : > { %p3658_p11 = scmp.ne.s32.totalorder %s5190_s29, %s3657_s25  ;;  %p3662_p10 = scmp.lt.u32.totalorder %s5190_s29, %s5291_s5 }
 0x2b8   : > { %p3663_p8 = scmp.lt.u32.totalorder %s3661_s16, %s3657_s25  ;;  %p3665_p9 = scmp.lt.u32.totalorder %s3657_s25, %s5190_s29 }
 0x2b9   : > { %p3659_p2 = pnand %p3658_p11, %p5330_p13 }
 0x2ba   : > { %p3664_p3 = por %p3663_p8, %p3662_p10 }
 0x2bb   : > { %p3660_p7 = pneg %p3659_p2 }
 0x2bc   : > { %p3666_p0 = por %p3665_p9, %p3664_p3 }
 0x2be   : > { %p3667_p1 = pnand %p3666_p0, %p3660_p7 }
 0x2c0   : > { %3670 = shalt.err (!%p3667_p1)
}
 0x2c1   : > { %s3781_s12 = smov 64   ;;  %s3782_s10 = smov 4  }
 0x2c2   : > { %3421 = dma.vmem_to_hbm [thread:$0]  (%p5330_p13), %s5192_s20, 2176, %s5190_s29, %s5222_s17, %s3781_s12, %s3781_s12, %s3782_s10  }
 0x2c3 PF: > { %p3437_p5 = scmp.ge.s32.totalorder %s3769_s7, 2  ;;  %s2719_s28 = sand.u32 1, %s3729_s21  }
 0x2c4   : > { %p5331_p6 = scmp.ne.s32.totalorder %s5320_s8, 0  ;;  %s2720_s13 = scalar_lea.sflag [#allocation4], %s2719_s28 }
 0x2c6   : > { %p3430_p4 = pnand %p3437_p5, %p5331_p6 }
 0x2c8   : > { %3720 = dma.done.wait (!%p3430_p4), %s2720_s13, 2176  }
 0x2c9   : > { %3722 = vsyncadd (!%p3430_p4), %s2720_s13, 4294965120  ;;  %s5332_s27 = sld [smem:[#allocation20_spill]]  ;;  %s2728_s30 = sand.u32 1, %s3741_s24  }
 0x2ca   : > { %s2729_s9 = scalar_lea.sflag [#allocation7], %s2728_s30 }
 0x2cf   : > { %p5333_p12 = scmp.ne.s32.totalorder %s5332_s27, 0 }
 0x2d1   : > { %p3433_p11 = pnand %p3437_p5, %p5333_p12 }
 0x2d3   : > { %3724 = dma.done.wait (!%p3433_p11), %s2729_s9, 4352  }
 0x2d4   : > { %3726 = vsyncadd (!%p3433_p11), %s2729_s9, 4294962944  ;;  %s26_s7 = sadd.s32 1, %s3769_s7   ;;  %s5334_s19 = sld [smem:[#allocation11_spill]] }
 0x2d5   : > { %p23_p13 = scmp.ge.s32.totalorder %s26_s7, 8   ;;  %s5335_s23 = sld [smem:[#allocation19_spill]] }
 0x2d6   : > { %s5336_s24 = sld [smem:[#allocation12_spill]]  ;;  %s5337_s25 = sld [smem:[#allocation13_spill]] }
 0x2d7   : > { %s5338_s26 = sld [smem:[#allocation18_spill]]  ;;  %s5339_s27 = sld [smem:[#allocation14_spill]] }
 0x2d8   : > { %s5340_s28 = sld [smem:[#allocation15_spill]]  ;;  %s5341_s29 = sld [smem:[#allocation16_spill]] }
 0x2d9   : > { %s5342_s30 = sld [smem:[#allocation17_spill]]  ;;  %s5343_s21 = smov %s3733_s22 }
 0x2da   : > { %s5344_s22 = smov %s5334_s19  ;;  %25 = sbr.rel (!%p23_p13) target bundleno = 13 (0xd), region = 111 }
 0x2e1   :  { %2734 = vsyncpa [#allocation3], 1 }
 0x2e2   :  { %2736 = vsyncpa [#allocation3 + $0x1], 1 }
 0x2e3   :  { %2737 = vsyncpa [#allocation4], 1 }
 0x2e4   :  { %2739 = vsyncpa [#allocation4 + $0x1], 1 }
 0x2e5   :  { %2740 = vsyncpa [#allocation7], 1 }
 0x2e6   :  { %2742 = vsyncpa [#allocation7 + $0x1], 1 }

</bundles_post_ra>
